<compile_context>
chip_gen: v7x
topology: tpu7x:2x2x1
jax: 0.10.0
libtpu: 0.0.40
codegen_flags: <defaults>
</compile_context>

<pallas_src>
import math
import functools

import jax
import jax.numpy as jnp
from jax import lax
from jax.experimental import pallas as pl
from jax.experimental.pallas import tpu as pltpu


def _round_up(n, m):
    return ((n + m - 1) // m) * m


def _gru_kernel(x_ref, h0_ref, wih_ref, whh_ref, bih_ref, bhn_ref,
                wlin_ref, blin_ref, out_ref, hn_ref,
                h_scratch, gi_scratch, hseq_scratch,
                *, hidden_size, tile_t, t_real, unroll):
    """One grid step == one chunk of `tile_t` timesteps.

    x_ref   : (tile_t*B, I_pad)  current chunk of (time-major, flattened) inputs
    out_ref : (tile_t*B, O_pad)  lane-dense log-prob slab for the chunk
    h0_ref  : (B, H) resident; hn_ref: (B, H) written on the last chunk only.
    bih_ref : (1, 3H) b_ih with b_hh's r/z thirds already folded in (host side).
    bhn_ref : (1, H)  b_hh's n third (must stay inside the r-multiply).
    """
    H = hidden_size
    B = h0_ref.shape[0]                       # padded batch (static)
    c = pl.program_id(0)
    rec_dtype = whh_ref.dtype                 # recurrence MXU operand dtype (f32 default)

    @pl.when(c == 0)
    def _():
        h_scratch[...] = h0_ref[...]

    # ---- (1) Input projections for the whole chunk: one big-M matmul. -----------
    # x is already in the weight dtype (pre-cast on host).  b_ih here already
    # contains b_hh_r / b_hh_z folded in.
    gi_scratch[...] = (
        jnp.dot(x_ref[...], wih_ref[...], preferred_element_type=jnp.float32)
        + bih_ref[...]
    )

    # Hoist the (small) recurrent n-bias broadcast out of the time loop.
    bhn = jnp.broadcast_to(bhn_ref[...], (B, H))                  # (B, H) f32

    h0 = h_scratch[...]                                           # (B, H) f32

    # ---- (2) Recurrence: bounded-unroll fori_loop over timesteps. ---------------
    # W_hh^T is loop-invariant; the MXU RHS push is hoisted by Mosaic.
    def step(t, h):
        off = pl.multiple_of(t * B, 8)
        gi = gi_scratch[pl.ds(off, B), :]                         # (B, 3H) f32
        gh = jnp.dot(h.astype(rec_dtype), whh_ref[...],
                     preferred_element_type=jnp.float32)          # (B, 3H) f32

        r = jax.nn.sigmoid(gi[:, 0:H] + gh[:, 0:H])
        z = jax.nn.sigmoid(gi[:, H:2 * H] + gh[:, H:2 * H])
        n = jnp.tanh(gi[:, 2 * H:3 * H] + r * (gh[:, 2 * H:3 * H] + bhn))
        h = (1.0 - z) * n + z * h

        hseq_scratch[pl.ds(off, B), :] = h
        return h

    h = lax.fori_loop(0, tile_t, step, h0, unroll=unroll)

    h_scratch[...] = h                        # carry to next chunk

    @pl.when(c == pl.num_programs(0) - 1)
    def _():
        # True last timestep always lives in the last chunk; static slice.
        last_off = ((t_real - 1) % tile_t) * B
        hn_ref[...] = hseq_scratch[last_off:last_off + B, :]

    # ---- (3) Linear + LogSoftmax for the whole chunk: one big-M matmul. ---------
    # Padded output columns carry a -1e9 bias (f32), so they never win the max and
    # their exp underflows to 0 -> log-softmax over the real columns is exact.
    logits = jnp.dot(hseq_scratch[...].astype(wlin_ref.dtype), wlin_ref[...],
                     preferred_element_type=jnp.float32) + blin_ref[...]
    m = jnp.max(logits, axis=-1, keepdims=True)
    lse = jnp.log(jnp.sum(jnp.exp(logits - m), axis=-1, keepdims=True)) + m
    out_ref[...] = logits - lse


def gru_forward(x, h0, w_ih, w_hh, b_ih, b_hh, w_lin, b_lin,
                *, tile_t=16, weight_dtype=jnp.bfloat16,
                recurrent_weight_dtype=jnp.float32):
    """x: (T, B, I) f32; h0: (1, B, H) f32.
    w_ih: (3H, I), w_hh: (3H, H), b_ih/b_hh: (3H,), w_lin: (O, H), b_lin: (O,).
    weight_dtype: dtype for x / W_ih / W_lin (the big chunk matmuls); bf16 default
      is the native single-pass MXU path on v5e/v6e/v7x.
    recurrent_weight_dtype: dtype for W_hh (and the per-step h cast).  Kept f32 by
      default so the carried hidden state never round-trips through bf16.
    Returns (log_probs (T, B, O) f32, hn (1, B, H) f32)."""
    T, B, I = x.shape
    H = h0.shape[-1]
    O = w_lin.shape[0]

    # Gate slices inside the kernel assume lane-aligned H.
    assert H % 128 == 0, "hidden_size must be a multiple of 128 (pad H otherwise)"

    B_pad = _round_up(B, 8)        # f32 sublane multiple
    I_pad = _round_up(I, 128)      # clean lane tiles for the input matmul K dim
    O_pad = _round_up(O, 128)      # lane-dense output slab (no masked vst)

    # Don't pay for padded timesteps on short sequences.
    tile_t = min(tile_t, _round_up(T, 8))
    T_pad = _round_up(T, tile_t)
    n_chunks = T_pad // tile_t
    unroll = min(8, tile_t)

    # --- padded / pre-transposed operands (row-major (M,K)@(K,N) matmuls) --------
    x_p = (jnp.zeros((T_pad, B_pad, I_pad), jnp.float32)
           .at[:T, :B, :I].set(x.astype(jnp.float32))
           .reshape(T_pad * B_pad, I_pad)
           .astype(weight_dtype))                                   # (T_pad*B_pad, I_pad)
    h0_p = jnp.zeros((B_pad, H), jnp.float32).at[:B, :].set(h0[0])  # (B_pad, H)

    wih_t = (jnp.zeros((I_pad, 3 * H), jnp.float32)
             .at[:I, :].set(jnp.asarray(w_ih, jnp.float32).T)
             .astype(weight_dtype))                                 # (I_pad, 3H)
    whh_t = (jnp.asarray(w_hh, jnp.float32).T
             .astype(recurrent_weight_dtype))                       # (H, 3H)
    wlin_t = (jnp.zeros((H, O_pad), jnp.float32)
              .at[:, :O].set(jnp.asarray(w_lin, jnp.float32).T)
              .astype(weight_dtype))                                # (H, O_pad)

    # Fold b_hh's r/z thirds into b_ih (the n third stays inside the r-multiply).
    b_ih_f = jnp.asarray(b_ih, jnp.float32)
    b_hh_f = jnp.asarray(b_hh, jnp.float32)
    bih2 = (b_ih_f.at[:2 * H].add(b_hh_f[:2 * H]))[None, :]         # (1, 3H)
    bhn2 = b_hh_f[2 * H:][None, :]                                  # (1, H)
    blin2 = (jnp.full((1, O_pad), -1e9, jnp.float32)
             .at[0, :O].set(jnp.asarray(b_lin, jnp.float32)))       # (1, O_pad)

    kernel = functools.partial(_gru_kernel, hidden_size=H, tile_t=tile_t,
                               t_real=T, unroll=unroll)

    grid_spec = pltpu.PrefetchScalarGridSpec(
        num_scalar_prefetch=0,
        grid=(n_chunks,),
        in_specs=[
            pl.BlockSpec((tile_t * B_pad, I_pad), lambda c: (c, 0)),  # x chunk
            pl.BlockSpec((B_pad, H), lambda c: (0, 0)),               # h0 (resident)
            pl.BlockSpec((I_pad, 3 * H), lambda c: (0, 0)),           # W_ih^T
            pl.BlockSpec((H, 3 * H), lambda c: (0, 0)),               # W_hh^T
            pl.BlockSpec((1, 3 * H), lambda c: (0, 0)),               # b_ih (+ b_hh r/z)
            pl.BlockSpec((1, H), lambda c: (0, 0)),                   # b_hh_n
            pl.BlockSpec((H, O_pad), lambda c: (0, 0)),               # W_lin^T
            pl.BlockSpec((1, O_pad), lambda c: (0, 0)),               # b_lin (-1e9 pad)
        ],
        out_specs=[
            pl.BlockSpec((tile_t * B_pad, O_pad), lambda c: (c, 0)),  # log-prob slab
            pl.BlockSpec((B_pad, H), lambda c: (0, 0)),               # hn (last chunk)
        ],
        scratch_shapes=[
            pltpu.VMEM((B_pad, H), jnp.float32),                  # carried hidden state
            pltpu.VMEM((tile_t * B_pad, 3 * H), jnp.float32),     # chunk input projections
            pltpu.VMEM((tile_t * B_pad, H), jnp.float32),         # chunk hidden states
        ],
    )

    out_shapes = (
        jax.ShapeDtypeStruct((T_pad * B_pad, O_pad), jnp.float32),
        jax.ShapeDtypeStruct((B_pad, H), jnp.float32),
    )

    out_flat, hn_pad = pl.pallas_call(
        kernel,
        out_shape=out_shapes,
        grid_spec=grid_spec,
        compiler_params=pltpu.CompilerParams(
            # Time chunks are strictly sequential (h is carried across them).
            dimension_semantics=("arbitrary",),
        ),
    )(x_p, h0_p, wih_t, whh_t, bih2, bhn2, wlin_t, blin2)

    log_probs = out_flat.reshape(T_pad, B_pad, O_pad)[:T, :B, :O]
    hn = hn_pad[:B, :][None]                                        # (1, B, H)
    return log_probs, hn


def _reference(x, h0, w_ih, w_hh, b_ih, b_hh, w_lin, b_lin):
    """Pure-JAX reference of the same forward pass (PyTorch GRU semantics)."""
    H = h0.shape[-1]
    P = jax.lax.Precision.HIGHEST
    h = h0[0]
    outs = []
    for t in range(x.shape[0]):
        xt = x[t]
        gi = jnp.dot(xt, w_ih.T, precision=P) + b_ih
        gh = jnp.dot(h, w_hh.T, precision=P) + b_hh
        i_r, i_z, i_n = gi[:, :H], gi[:, H:2 * H], gi[:, 2 * H:]
        h_r, h_z, h_n = gh[:, :H], gh[:, H:2 * H], gh[:, 2 * H:]
        r = jax.nn.sigmoid(i_r + h_r)
        z = jax.nn.sigmoid(i_z + h_z)
        n = jnp.tanh(i_n + r * h_n)
        h = (1.0 - z) * n + z * h
        logits = jnp.dot(h, w_lin.T, precision=P) + b_lin
        outs.append(jax.nn.log_softmax(logits, axis=-1))
    return jnp.stack(outs, axis=0), h[None]


if __name__ == "__main__":
    # Shapes implied by the module: n_letters = 52 + 5 = 57, n_hidden = 128,
    # output_size = n_categories (all_categories is empty in the script -> use the
    # classic 18-language name-classification size).
    input_size = 57
    hidden_size = 128
    output_size = 18

    key = jax.random.PRNGKey(0)
    ks = jax.random.split(key, 8)
    bound = 1.0 / math.sqrt(hidden_size)
    uni = lambda k, shape: jax.random.uniform(k, shape, jnp.float32, -bound, bound)

    w_ih = uni(ks[0], (3 * hidden_size, input_size))
    w_hh = uni(ks[1], (3 * hidden_size, hidden_size))
    b_ih = uni(ks[2], (3 * hidden_size,))
    b_hh = uni(ks[3], (3 * hidden_size,))
    w_lin = uni(ks[4], (output_size, hidden_size))
    b_lin = uni(ks[5], (output_size,))

    # --- case 1: exactly the module's forward() call shape: T=1, B=1 (letter 'B'),
    #     f32 weights for a tight-tolerance check against the reference. ----------
    x1 = jnp.zeros((1, 1, input_size), jnp.float32).at[0, 0, 27].set(1.0)
    h01 = jnp.zeros((1, 1, hidden_size), jnp.float32)
    lp1, hn1 = gru_forward(x1, h01, w_ih, w_hh, b_ih, b_hh, w_lin, b_lin,
                           weight_dtype=jnp.float32)
    jax.block_until_ready((lp1, hn1))
    r_lp1, r_hn1 = _reference(x1, h01, w_ih, w_hh, b_ih, b_hh, w_lin, b_lin)
    assert lp1.shape == (1, 1, output_size) and hn1.shape == (1, 1, hidden_size)
    assert jnp.allclose(lp1, r_lp1, atol=2e-4, rtol=2e-4)
    assert jnp.allclose(hn1, r_hn1, atol=2e-4, rtol=2e-4)

    # --- case 2: longer one-hot sequence, small batch, f32 path (T/B padding). ---
    T, B = 12, 2
    idx = jax.random.randint(ks[6], (T, B), 0, input_size)
    x2 = jax.nn.one_hot(idx, input_size, dtype=jnp.float32)
    h02 = jnp.zeros((1, B, hidden_size), jnp.float32)
    lp2, hn2 = gru_forward(x2, h02, w_ih, w_hh, b_ih, b_hh, w_lin, b_lin,
                           weight_dtype=jnp.float32)
    jax.block_until_ready((lp2, hn2))
    r_lp2, r_hn2 = _reference(x2, h02, w_ih, w_hh, b_ih, b_hh, w_lin, b_lin)
    assert lp2.shape == (T, B, output_size) and hn2.shape == (1, B, hidden_size)
    assert jnp.allclose(lp2, r_lp2, atol=2e-4, rtol=2e-4)
    assert jnp.allclose(hn2, r_hn2, atol=2e-4, rtol=2e-4)

    # --- case 3: default bf16 weight path (native MXU dtype on all generations);
    #     recurrence kept f32, so tolerance is set by the two bf16 chunk matmuls. --
    lp3, hn3 = gru_forward(x2, h02, w_ih, w_hh, b_ih, b_hh, w_lin, b_lin)
    jax.block_until_ready((lp3, hn3))
    assert jnp.allclose(lp3, r_lp2, atol=5e-2, rtol=5e-2)
    assert jnp.allclose(hn3, r_hn2, atol=5e-2, rtol=5e-2)

    print("KERNEL_OK")
</pallas_src>

<mosaic_0001>
module attributes {stable_mosaic.version = 11 : i64} {
  func.func @_gru_kernel(%arg0: i32, %arg1: memref<64x128xf32, #tpu.memory_space<vmem>>, %arg2: memref<8x128xf32, #tpu.memory_space<vmem>>, %arg3: memref<128x384xf32, #tpu.memory_space<vmem>>, %arg4: memref<128x384xf32, #tpu.memory_space<vmem>>, %arg5: memref<1x384xf32, #tpu.memory_space<vmem>>, %arg6: memref<1x128xf32, #tpu.memory_space<vmem>>, %arg7: memref<128x128xf32, #tpu.memory_space<vmem>>, %arg8: memref<1x128xf32, #tpu.memory_space<vmem>>, %arg9: memref<64x128xf32, #tpu.memory_space<vmem>>, %arg10: memref<8x128xf32, #tpu.memory_space<vmem>>, %arg11: memref<8x128xf32, #tpu.memory_space<vmem>>, %arg12: memref<64x384xf32, #tpu.memory_space<vmem>>, %arg13: memref<64x128xf32, #tpu.memory_space<vmem>>) attributes {dimension_semantics = [#tpu.dimension_semantics<arbitrary>], iteration_bounds = array<i64: 1>, scalar_prefetch = 0 : i64, scratch_operands = 3 : i64, tpu.core_type = #tpu.core_type<tc>, window_params = [{transform_indices = @transform_0, window_bounds = array<i64: 64, 128>}, {pipeline_mode = #tpu.pipeline_mode<synchronous>, transform_indices = @transform_1, window_bounds = array<i64: 8, 128>}, {pipeline_mode = #tpu.pipeline_mode<synchronous>, transform_indices = @transform_2, window_bounds = array<i64: 128, 384>}, {pipeline_mode = #tpu.pipeline_mode<synchronous>, transform_indices = @transform_3, window_bounds = array<i64: 128, 384>}, {pipeline_mode = #tpu.pipeline_mode<synchronous>, transform_indices = @transform_4, window_bounds = array<i64: 1, 384>}, {pipeline_mode = #tpu.pipeline_mode<synchronous>, transform_indices = @transform_5, window_bounds = array<i64: 1, 128>}, {pipeline_mode = #tpu.pipeline_mode<synchronous>, transform_indices = @transform_6, window_bounds = array<i64: 128, 128>}, {pipeline_mode = #tpu.pipeline_mode<synchronous>, transform_indices = @transform_7, window_bounds = array<i64: 1, 128>}, {transform_indices = @transform_8, window_bounds = array<i64: 64, 128>}, {pipeline_mode = #tpu.pipeline_mode<synchronous>, transform_indices = @transform_9, window_bounds = array<i64: 8, 128>}]} {
    %c0_i32 = arith.constant 0 : i32
    %0 = arith.cmpi eq, %arg0, %c0_i32 : i32
    %1 = arith.extui %0 : i1 to i32
    %c0_i32_0 = arith.constant 0 : i32
    %2 = arith.cmpi ne, %1, %c0_i32_0 : i32
    scf.if %2 {
      %c0_100 = arith.constant 0 : index
      %c0_101 = arith.constant 0 : index
      %316 = vector.load %arg2[%c0_100, %c0_101] : memref<8x128xf32, #tpu.memory_space<vmem>>, vector<8x128xf32>
      %c0_102 = arith.constant 0 : index
      %c0_103 = arith.constant 0 : index
      %317 = vector.load %arg11[%c0_102, %c0_103] : memref<8x128xf32, #tpu.memory_space<vmem>>, vector<8x128xf32>
      tpu.vector_store %arg11[%c0_102, %c0_103], %316 {strides = array<i32>} : memref<8x128xf32, #tpu.memory_space<vmem>>, vector<8x128xf32>,
    } else {
    }
    %c0 = arith.constant 0 : index
    %c0_1 = arith.constant 0 : index
    %3 = vector.load %arg1[%c0, %c0_1] : memref<64x128xf32, #tpu.memory_space<vmem>>, vector<64x128xf32>
    %c0_2 = arith.constant 0 : index
    %c0_3 = arith.constant 0 : index
    %4 = vector.load %arg3[%c0_2, %c0_3] : memref<128x384xf32, #tpu.memory_space<vmem>>, vector<128x384xf32>
    %cst = arith.constant dense<0.000000e+00> : vector<64x384xf32>
    %5 = tpu.matmul %3, %4, %cst {dimension_numbers = #tpu.dot_dimension_numbers<[1], [0], [0], [1], [0, 0, 1, 1], [], []>} : vector<64x128xf32>, vector<128x384xf32>, vector<64x384xf32> -> vector<64x384xf32>
    %c0_4 = arith.constant 0 : index
    %c0_5 = arith.constant 0 : index
    %6 = vector.load %arg5[%c0_4, %c0_5] : memref<1x384xf32, #tpu.memory_space<vmem>>, vector<1x384xf32>
    %7 = vector.broadcast %6 : vector<1x384xf32> to vector<64x384xf32>
    %8 = arith.addf %5, %7 : vector<64x384xf32>
    %c0_6 = arith.constant 0 : index
    %c0_7 = arith.constant 0 : index
    %9 = vector.load %arg12[%c0_6, %c0_7] : memref<64x384xf32, #tpu.memory_space<vmem>>, vector<64x384xf32>
    tpu.vector_store %arg12[%c0_6, %c0_7], %8 {strides = array<i32>} : memref<64x384xf32, #tpu.memory_space<vmem>>, vector<64x384xf32>,
    %c0_8 = arith.constant 0 : index
    %c0_9 = arith.constant 0 : index
    %10 = vector.load %arg6[%c0_8, %c0_9] : memref<1x128xf32, #tpu.memory_space<vmem>>, vector<1x128xf32>
    %11 = vector.shape_cast %10 : vector<1x128xf32> to vector<1x128xf32>
    %12 = vector.broadcast %11 : vector<1x128xf32> to vector<8x128xf32>
    %c0_10 = arith.constant 0 : index
    %c0_11 = arith.constant 0 : index
    %13 = vector.load %arg11[%c0_10, %c0_11] : memref<8x128xf32, #tpu.memory_space<vmem>>, vector<8x128xf32>
    %c0_i32_12 = arith.constant 0 : i32
    %c8_i32 = arith.constant 8 : i32
    %14 = arith.muli %c0_i32_12, %c8_i32 : i32
    %15 = tpu.assume_multiple %14, 8 : i32
    %16 = arith.index_cast %15 : i32 to index
    %c0_13 = arith.constant 0 : index
    %17 = vector.load %arg12[%16, %c0_13] : memref<64x384xf32, #tpu.memory_space<vmem>>, vector<8x384xf32>
    %c0_14 = arith.constant 0 : index
    %c0_15 = arith.constant 0 : index
    %18 = vector.load %arg4[%c0_14, %c0_15] : memref<128x384xf32, #tpu.memory_space<vmem>>, vector<128x384xf32>
    %cst_16 = arith.constant dense<0.000000e+00> : vector<8x384xf32>
    %19 = tpu.matmul %13, %18, %cst_16 {dimension_numbers = #tpu.dot_dimension_numbers<[1], [0], [0], [1], [0, 0, 1, 1], [], []>} : vector<8x128xf32>, vector<128x384xf32>, vector<8x384xf32> -> vector<8x384xf32>
    %20 = vector.extract_strided_slice %17 {offsets = [0, 0], sizes = [8, 128], strides = [1, 1]} : vector<8x384xf32> to vector<8x128xf32>
    %21 = vector.extract_strided_slice %19 {offsets = [0, 0], sizes = [8, 128], strides = [1, 1]} : vector<8x384xf32> to vector<8x128xf32>
    %22 = arith.addf %20, %21 : vector<8x128xf32>
    %23 = arith.negf %22 : vector<8x128xf32>
    %24 = math.exp %23 : vector<8x128xf32>
    %cst_17 = arith.constant 1.000000e+00 : f32
    %25 = vector.broadcast %cst_17 : f32 to vector<8x128xf32>
    %26 = arith.addf %25, %24 : vector<8x128xf32>
    %27 = arith.divf %25, %26 : vector<8x128xf32>
    %28 = vector.extract_strided_slice %17 {offsets = [0, 128], sizes = [8, 128], strides = [1, 1]} : vector<8x384xf32> to vector<8x128xf32>
    %29 = vector.extract_strided_slice %19 {offsets = [0, 128], sizes = [8, 128], strides = [1, 1]} : vector<8x384xf32> to vector<8x128xf32>
    %30 = arith.addf %28, %29 : vector<8x128xf32>
    %31 = arith.negf %30 : vector<8x128xf32>
    %32 = math.exp %31 : vector<8x128xf32>
    %cst_18 = arith.constant 1.000000e+00 : f32
    %33 = vector.broadcast %cst_18 : f32 to vector<8x128xf32>
    %34 = arith.addf %33, %32 : vector<8x128xf32>
    %35 = arith.divf %33, %34 : vector<8x128xf32>
    %36 = vector.extract_strided_slice %17 {offsets = [0, 256], sizes = [8, 128], strides = [1, 1]} : vector<8x384xf32> to vector<8x128xf32>
    %37 = vector.extract_strided_slice %19 {offsets = [0, 256], sizes = [8, 128], strides = [1, 1]} : vector<8x384xf32> to vector<8x128xf32>
    %38 = arith.addf %37, %12 : vector<8x128xf32>
    %39 = arith.mulf %27, %38 : vector<8x128xf32>
    %40 = arith.addf %36, %39 : vector<8x128xf32>
    %41 = math.tanh %40 : vector<8x128xf32>
    %cst_19 = arith.constant 1.000000e+00 : f32
    %42 = vector.broadcast %cst_19 : f32 to vector<8x128xf32>
    %43 = arith.subf %42, %35 : vector<8x128xf32>
    %44 = arith.mulf %43, %41 : vector<8x128xf32>
    %45 = arith.mulf %35, %13 : vector<8x128xf32>
    %46 = arith.addf %44, %45 : vector<8x128xf32>
    %47 = arith.index_cast %15 : i32 to index
    %c0_20 = arith.constant 0 : index
    %48 = vector.load %arg13[%47, %c0_20] : memref<64x128xf32, #tpu.memory_space<vmem>>, vector<8x128xf32>
    tpu.vector_store %arg13[%47, %c0_20], %46 {strides = array<i32>} : memref<64x128xf32, #tpu.memory_space<vmem>>, vector<8x128xf32>,
    %c1_i32 = arith.constant 1 : i32
    %c8_i32_21 = arith.constant 8 : i32
    %49 = arith.muli %c1_i32, %c8_i32_21 : i32
    %50 = tpu.assume_multiple %49, 8 : i32
    %51 = arith.index_cast %50 : i32 to index
    %c0_22 = arith.constant 0 : index
    %52 = vector.load %arg12[%51, %c0_22] : memref<64x384xf32, #tpu.memory_space<vmem>>, vector<8x384xf32>
    %c0_23 = arith.constant 0 : index
    %c0_24 = arith.constant 0 : index
    %53 = vector.load %arg4[%c0_23, %c0_24] : memref<128x384xf32, #tpu.memory_space<vmem>>, vector<128x384xf32>
    %cst_25 = arith.constant dense<0.000000e+00> : vector<8x384xf32>
    %54 = tpu.matmul %46, %53, %cst_25 {dimension_numbers = #tpu.dot_dimension_numbers<[1], [0], [0], [1], [0, 0, 1, 1], [], []>} : vector<8x128xf32>, vector<128x384xf32>, vector<8x384xf32> -> vector<8x384xf32>
    %55 = vector.extract_strided_slice %52 {offsets = [0, 0], sizes = [8, 128], strides = [1, 1]} : vector<8x384xf32> to vector<8x128xf32>
    %56 = vector.extract_strided_slice %54 {offsets = [0, 0], sizes = [8, 128], strides = [1, 1]} : vector<8x384xf32> to vector<8x128xf32>
    %57 = arith.addf %55, %56 : vector<8x128xf32>
    %58 = arith.negf %57 : vector<8x128xf32>
    %59 = math.exp %58 : vector<8x128xf32>
    %cst_26 = arith.constant 1.000000e+00 : f32
    %60 = vector.broadcast %cst_26 : f32 to vector<8x128xf32>
    %61 = arith.addf %60, %59 : vector<8x128xf32>
    %62 = arith.divf %60, %61 : vector<8x128xf32>
    %63 = vector.extract_strided_slice %52 {offsets = [0, 128], sizes = [8, 128], strides = [1, 1]} : vector<8x384xf32> to vector<8x128xf32>
    %64 = vector.extract_strided_slice %54 {offsets = [0, 128], sizes = [8, 128], strides = [1, 1]} : vector<8x384xf32> to vector<8x128xf32>
    %65 = arith.addf %63, %64 : vector<8x128xf32>
    %66 = arith.negf %65 : vector<8x128xf32>
    %67 = math.exp %66 : vector<8x128xf32>
    %cst_27 = arith.constant 1.000000e+00 : f32
    %68 = vector.broadcast %cst_27 : f32 to vector<8x128xf32>
    %69 = arith.addf %68, %67 : vector<8x128xf32>
    %70 = arith.divf %68, %69 : vector<8x128xf32>
    %71 = vector.extract_strided_slice %52 {offsets = [0, 256], sizes = [8, 128], strides = [1, 1]} : vector<8x384xf32> to vector<8x128xf32>
    %72 = vector.extract_strided_slice %54 {offsets = [0, 256], sizes = [8, 128], strides = [1, 1]} : vector<8x384xf32> to vector<8x128xf32>
    %73 = arith.addf %72, %12 : vector<8x128xf32>
    %74 = arith.mulf %62, %73 : vector<8x128xf32>
    %75 = arith.addf %71, %74 : vector<8x128xf32>
    %76 = math.tanh %75 : vector<8x128xf32>
    %cst_28 = arith.constant 1.000000e+00 : f32
    %77 = vector.broadcast %cst_28 : f32 to vector<8x128xf32>
    %78 = arith.subf %77, %70 : vector<8x128xf32>
    %79 = arith.mulf %78, %76 : vector<8x128xf32>
    %80 = arith.mulf %70, %46 : vector<8x128xf32>
    %81 = arith.addf %79, %80 : vector<8x128xf32>
    %82 = arith.index_cast %50 : i32 to index
    %c0_29 = arith.constant 0 : index
    %83 = vector.load %arg13[%82, %c0_29] : memref<64x128xf32, #tpu.memory_space<vmem>>, vector<8x128xf32>
    tpu.vector_store %arg13[%82, %c0_29], %81 {strides = array<i32>} : memref<64x128xf32, #tpu.memory_space<vmem>>, vector<8x128xf32>,
    %c2_i32 = arith.constant 2 : i32
    %c8_i32_30 = arith.constant 8 : i32
    %84 = arith.muli %c2_i32, %c8_i32_30 : i32
    %85 = tpu.assume_multiple %84, 8 : i32
    %86 = arith.index_cast %85 : i32 to index
    %c0_31 = arith.constant 0 : index
    %87 = vector.load %arg12[%86, %c0_31] : memref<64x384xf32, #tpu.memory_space<vmem>>, vector<8x384xf32>
    %c0_32 = arith.constant 0 : index
    %c0_33 = arith.constant 0 : index
    %88 = vector.load %arg4[%c0_32, %c0_33] : memref<128x384xf32, #tpu.memory_space<vmem>>, vector<128x384xf32>
    %cst_34 = arith.constant dense<0.000000e+00> : vector<8x384xf32>
    %89 = tpu.matmul %81, %88, %cst_34 {dimension_numbers = #tpu.dot_dimension_numbers<[1], [0], [0], [1], [0, 0, 1, 1], [], []>} : vector<8x128xf32>, vector<128x384xf32>, vector<8x384xf32> -> vector<8x384xf32>
    %90 = vector.extract_strided_slice %87 {offsets = [0, 0], sizes = [8, 128], strides = [1, 1]} : vector<8x384xf32> to vector<8x128xf32>
    %91 = vector.extract_strided_slice %89 {offsets = [0, 0], sizes = [8, 128], strides = [1, 1]} : vector<8x384xf32> to vector<8x128xf32>
    %92 = arith.addf %90, %91 : vector<8x128xf32>
    %93 = arith.negf %92 : vector<8x128xf32>
    %94 = math.exp %93 : vector<8x128xf32>
    %cst_35 = arith.constant 1.000000e+00 : f32
    %95 = vector.broadcast %cst_35 : f32 to vector<8x128xf32>
    %96 = arith.addf %95, %94 : vector<8x128xf32>
    %97 = arith.divf %95, %96 : vector<8x128xf32>
    %98 = vector.extract_strided_slice %87 {offsets = [0, 128], sizes = [8, 128], strides = [1, 1]} : vector<8x384xf32> to vector<8x128xf32>
    %99 = vector.extract_strided_slice %89 {offsets = [0, 128], sizes = [8, 128], strides = [1, 1]} : vector<8x384xf32> to vector<8x128xf32>
    %100 = arith.addf %98, %99 : vector<8x128xf32>
    %101 = arith.negf %100 : vector<8x128xf32>
    %102 = math.exp %101 : vector<8x128xf32>
    %cst_36 = arith.constant 1.000000e+00 : f32
    %103 = vector.broadcast %cst_36 : f32 to vector<8x128xf32>
    %104 = arith.addf %103, %102 : vector<8x128xf32>
    %105 = arith.divf %103, %104 : vector<8x128xf32>
    %106 = vector.extract_strided_slice %87 {offsets = [0, 256], sizes = [8, 128], strides = [1, 1]} : vector<8x384xf32> to vector<8x128xf32>
    %107 = vector.extract_strided_slice %89 {offsets = [0, 256], sizes = [8, 128], strides = [1, 1]} : vector<8x384xf32> to vector<8x128xf32>
    %108 = arith.addf %107, %12 : vector<8x128xf32>
    %109 = arith.mulf %97, %108 : vector<8x128xf32>
    %110 = arith.addf %106, %109 : vector<8x128xf32>
    %111 = math.tanh %110 : vector<8x128xf32>
    %cst_37 = arith.constant 1.000000e+00 : f32
    %112 = vector.broadcast %cst_37 : f32 to vector<8x128xf32>
    %113 = arith.subf %112, %105 : vector<8x128xf32>
    %114 = arith.mulf %113, %111 : vector<8x128xf32>
    %115 = arith.mulf %105, %81 : vector<8x128xf32>
    %116 = arith.addf %114, %115 : vector<8x128xf32>
    %117 = arith.index_cast %85 : i32 to index
    %c0_38 = arith.constant 0 : index
    %118 = vector.load %arg13[%117, %c0_38] : memref<64x128xf32, #tpu.memory_space<vmem>>, vector<8x128xf32>
    tpu.vector_store %arg13[%117, %c0_38], %116 {strides = array<i32>} : memref<64x128xf32, #tpu.memory_space<vmem>>, vector<8x128xf32>,
    %c3_i32 = arith.constant 3 : i32
    %c8_i32_39 = arith.constant 8 : i32
    %119 = arith.muli %c3_i32, %c8_i32_39 : i32
    %120 = tpu.assume_multiple %119, 8 : i32
    %121 = arith.index_cast %120 : i32 to index
    %c0_40 = arith.constant 0 : index
    %122 = vector.load %arg12[%121, %c0_40] : memref<64x384xf32, #tpu.memory_space<vmem>>, vector<8x384xf32>
    %c0_41 = arith.constant 0 : index
    %c0_42 = arith.constant 0 : index
    %123 = vector.load %arg4[%c0_41, %c0_42] : memref<128x384xf32, #tpu.memory_space<vmem>>, vector<128x384xf32>
    %cst_43 = arith.constant dense<0.000000e+00> : vector<8x384xf32>
    %124 = tpu.matmul %116, %123, %cst_43 {dimension_numbers = #tpu.dot_dimension_numbers<[1], [0], [0], [1], [0, 0, 1, 1], [], []>} : vector<8x128xf32>, vector<128x384xf32>, vector<8x384xf32> -> vector<8x384xf32>
    %125 = vector.extract_strided_slice %122 {offsets = [0, 0], sizes = [8, 128], strides = [1, 1]} : vector<8x384xf32> to vector<8x128xf32>
    %126 = vector.extract_strided_slice %124 {offsets = [0, 0], sizes = [8, 128], strides = [1, 1]} : vector<8x384xf32> to vector<8x128xf32>
    %127 = arith.addf %125, %126 : vector<8x128xf32>
    %128 = arith.negf %127 : vector<8x128xf32>
    %129 = math.exp %128 : vector<8x128xf32>
    %cst_44 = arith.constant 1.000000e+00 : f32
    %130 = vector.broadcast %cst_44 : f32 to vector<8x128xf32>
    %131 = arith.addf %130, %129 : vector<8x128xf32>
    %132 = arith.divf %130, %131 : vector<8x128xf32>
    %133 = vector.extract_strided_slice %122 {offsets = [0, 128], sizes = [8, 128], strides = [1, 1]} : vector<8x384xf32> to vector<8x128xf32>
    %134 = vector.extract_strided_slice %124 {offsets = [0, 128], sizes = [8, 128], strides = [1, 1]} : vector<8x384xf32> to vector<8x128xf32>
    %135 = arith.addf %133, %134 : vector<8x128xf32>
    %136 = arith.negf %135 : vector<8x128xf32>
    %137 = math.exp %136 : vector<8x128xf32>
    %cst_45 = arith.constant 1.000000e+00 : f32
    %138 = vector.broadcast %cst_45 : f32 to vector<8x128xf32>
    %139 = arith.addf %138, %137 : vector<8x128xf32>
    %140 = arith.divf %138, %139 : vector<8x128xf32>
    %141 = vector.extract_strided_slice %122 {offsets = [0, 256], sizes = [8, 128], strides = [1, 1]} : vector<8x384xf32> to vector<8x128xf32>
    %142 = vector.extract_strided_slice %124 {offsets = [0, 256], sizes = [8, 128], strides = [1, 1]} : vector<8x384xf32> to vector<8x128xf32>
    %143 = arith.addf %142, %12 : vector<8x128xf32>
    %144 = arith.mulf %132, %143 : vector<8x128xf32>
    %145 = arith.addf %141, %144 : vector<8x128xf32>
    %146 = math.tanh %145 : vector<8x128xf32>
    %cst_46 = arith.constant 1.000000e+00 : f32
    %147 = vector.broadcast %cst_46 : f32 to vector<8x128xf32>
    %148 = arith.subf %147, %140 : vector<8x128xf32>
    %149 = arith.mulf %148, %146 : vector<8x128xf32>
    %150 = arith.mulf %140, %116 : vector<8x128xf32>
    %151 = arith.addf %149, %150 : vector<8x128xf32>
    %152 = arith.index_cast %120 : i32 to index
    %c0_47 = arith.constant 0 : index
    %153 = vector.load %arg13[%152, %c0_47] : memref<64x128xf32, #tpu.memory_space<vmem>>, vector<8x128xf32>
    tpu.vector_store %arg13[%152, %c0_47], %151 {strides = array<i32>} : memref<64x128xf32, #tpu.memory_space<vmem>>, vector<8x128xf32>,
    %c4_i32 = arith.constant 4 : i32
    %c8_i32_48 = arith.constant 8 : i32
    %154 = arith.muli %c4_i32, %c8_i32_48 : i32
    %155 = tpu.assume_multiple %154, 8 : i32
    %156 = arith.index_cast %155 : i32 to index
    %c0_49 = arith.constant 0 : index
    %157 = vector.load %arg12[%156, %c0_49] : memref<64x384xf32, #tpu.memory_space<vmem>>, vector<8x384xf32>
    %c0_50 = arith.constant 0 : index
    %c0_51 = arith.constant 0 : index
    %158 = vector.load %arg4[%c0_50, %c0_51] : memref<128x384xf32, #tpu.memory_space<vmem>>, vector<128x384xf32>
    %cst_52 = arith.constant dense<0.000000e+00> : vector<8x384xf32>
    %159 = tpu.matmul %151, %158, %cst_52 {dimension_numbers = #tpu.dot_dimension_numbers<[1], [0], [0], [1], [0, 0, 1, 1], [], []>} : vector<8x128xf32>, vector<128x384xf32>, vector<8x384xf32> -> vector<8x384xf32>
    %160 = vector.extract_strided_slice %157 {offsets = [0, 0], sizes = [8, 128], strides = [1, 1]} : vector<8x384xf32> to vector<8x128xf32>
    %161 = vector.extract_strided_slice %159 {offsets = [0, 0], sizes = [8, 128], strides = [1, 1]} : vector<8x384xf32> to vector<8x128xf32>
    %162 = arith.addf %160, %161 : vector<8x128xf32>
    %163 = arith.negf %162 : vector<8x128xf32>
    %164 = math.exp %163 : vector<8x128xf32>
    %cst_53 = arith.constant 1.000000e+00 : f32
    %165 = vector.broadcast %cst_53 : f32 to vector<8x128xf32>
    %166 = arith.addf %165, %164 : vector<8x128xf32>
    %167 = arith.divf %165, %166 : vector<8x128xf32>
    %168 = vector.extract_strided_slice %157 {offsets = [0, 128], sizes = [8, 128], strides = [1, 1]} : vector<8x384xf32> to vector<8x128xf32>
    %169 = vector.extract_strided_slice %159 {offsets = [0, 128], sizes = [8, 128], strides = [1, 1]} : vector<8x384xf32> to vector<8x128xf32>
    %170 = arith.addf %168, %169 : vector<8x128xf32>
    %171 = arith.negf %170 : vector<8x128xf32>
    %172 = math.exp %171 : vector<8x128xf32>
    %cst_54 = arith.constant 1.000000e+00 : f32
    %173 = vector.broadcast %cst_54 : f32 to vector<8x128xf32>
    %174 = arith.addf %173, %172 : vector<8x128xf32>
    %175 = arith.divf %173, %174 : vector<8x128xf32>
    %176 = vector.extract_strided_slice %157 {offsets = [0, 256], sizes = [8, 128], strides = [1, 1]} : vector<8x384xf32> to vector<8x128xf32>
    %177 = vector.extract_strided_slice %159 {offsets = [0, 256], sizes = [8, 128], strides = [1, 1]} : vector<8x384xf32> to vector<8x128xf32>
    %178 = arith.addf %177, %12 : vector<8x128xf32>
    %179 = arith.mulf %167, %178 : vector<8x128xf32>
    %180 = arith.addf %176, %179 : vector<8x128xf32>
    %181 = math.tanh %180 : vector<8x128xf32>
    %cst_55 = arith.constant 1.000000e+00 : f32
    %182 = vector.broadcast %cst_55 : f32 to vector<8x128xf32>
    %183 = arith.subf %182, %175 : vector<8x128xf32>
    %184 = arith.mulf %183, %181 : vector<8x128xf32>
    %185 = arith.mulf %175, %151 : vector<8x128xf32>
    %186 = arith.addf %184, %185 : vector<8x128xf32>
    %187 = arith.index_cast %155 : i32 to index
    %c0_56 = arith.constant 0 : index
    %188 = vector.load %arg13[%187, %c0_56] : memref<64x128xf32, #tpu.memory_space<vmem>>, vector<8x128xf32>
    tpu.vector_store %arg13[%187, %c0_56], %186 {strides = array<i32>} : memref<64x128xf32, #tpu.memory_space<vmem>>, vector<8x128xf32>,
    %c5_i32 = arith.constant 5 : i32
    %c8_i32_57 = arith.constant 8 : i32
    %189 = arith.muli %c5_i32, %c8_i32_57 : i32
    %190 = tpu.assume_multiple %189, 8 : i32
    %191 = arith.index_cast %190 : i32 to index
    %c0_58 = arith.constant 0 : index
    %192 = vector.load %arg12[%191, %c0_58] : memref<64x384xf32, #tpu.memory_space<vmem>>, vector<8x384xf32>
    %c0_59 = arith.constant 0 : index
    %c0_60 = arith.constant 0 : index
    %193 = vector.load %arg4[%c0_59, %c0_60] : memref<128x384xf32, #tpu.memory_space<vmem>>, vector<128x384xf32>
    %cst_61 = arith.constant dense<0.000000e+00> : vector<8x384xf32>
    %194 = tpu.matmul %186, %193, %cst_61 {dimension_numbers = #tpu.dot_dimension_numbers<[1], [0], [0], [1], [0, 0, 1, 1], [], []>} : vector<8x128xf32>, vector<128x384xf32>, vector<8x384xf32> -> vector<8x384xf32>
    %195 = vector.extract_strided_slice %192 {offsets = [0, 0], sizes = [8, 128], strides = [1, 1]} : vector<8x384xf32> to vector<8x128xf32>
    %196 = vector.extract_strided_slice %194 {offsets = [0, 0], sizes = [8, 128], strides = [1, 1]} : vector<8x384xf32> to vector<8x128xf32>
    %197 = arith.addf %195, %196 : vector<8x128xf32>
    %198 = arith.negf %197 : vector<8x128xf32>
    %199 = math.exp %198 : vector<8x128xf32>
    %cst_62 = arith.constant 1.000000e+00 : f32
    %200 = vector.broadcast %cst_62 : f32 to vector<8x128xf32>
    %201 = arith.addf %200, %199 : vector<8x128xf32>
    %202 = arith.divf %200, %201 : vector<8x128xf32>
    %203 = vector.extract_strided_slice %192 {offsets = [0, 128], sizes = [8, 128], strides = [1, 1]} : vector<8x384xf32> to vector<8x128xf32>
    %204 = vector.extract_strided_slice %194 {offsets = [0, 128], sizes = [8, 128], strides = [1, 1]} : vector<8x384xf32> to vector<8x128xf32>
    %205 = arith.addf %203, %204 : vector<8x128xf32>
    %206 = arith.negf %205 : vector<8x128xf32>
    %207 = math.exp %206 : vector<8x128xf32>
    %cst_63 = arith.constant 1.000000e+00 : f32
    %208 = vector.broadcast %cst_63 : f32 to vector<8x128xf32>
    %209 = arith.addf %208, %207 : vector<8x128xf32>
    %210 = arith.divf %208, %209 : vector<8x128xf32>
    %211 = vector.extract_strided_slice %192 {offsets = [0, 256], sizes = [8, 128], strides = [1, 1]} : vector<8x384xf32> to vector<8x128xf32>
    %212 = vector.extract_strided_slice %194 {offsets = [0, 256], sizes = [8, 128], strides = [1, 1]} : vector<8x384xf32> to vector<8x128xf32>
    %213 = arith.addf %212, %12 : vector<8x128xf32>
    %214 = arith.mulf %202, %213 : vector<8x128xf32>
    %215 = arith.addf %211, %214 : vector<8x128xf32>
    %216 = math.tanh %215 : vector<8x128xf32>
    %cst_64 = arith.constant 1.000000e+00 : f32
    %217 = vector.broadcast %cst_64 : f32 to vector<8x128xf32>
    %218 = arith.subf %217, %210 : vector<8x128xf32>
    %219 = arith.mulf %218, %216 : vector<8x128xf32>
    %220 = arith.mulf %210, %186 : vector<8x128xf32>
    %221 = arith.addf %219, %220 : vector<8x128xf32>
    %222 = arith.index_cast %190 : i32 to index
    %c0_65 = arith.constant 0 : index
    %223 = vector.load %arg13[%222, %c0_65] : memref<64x128xf32, #tpu.memory_space<vmem>>, vector<8x128xf32>
    tpu.vector_store %arg13[%222, %c0_65], %221 {strides = array<i32>} : memref<64x128xf32, #tpu.memory_space<vmem>>, vector<8x128xf32>,
    %c6_i32 = arith.constant 6 : i32
    %c8_i32_66 = arith.constant 8 : i32
    %224 = arith.muli %c6_i32, %c8_i32_66 : i32
    %225 = tpu.assume_multiple %224, 8 : i32
    %226 = arith.index_cast %225 : i32 to index
    %c0_67 = arith.constant 0 : index
    %227 = vector.load %arg12[%226, %c0_67] : memref<64x384xf32, #tpu.memory_space<vmem>>, vector<8x384xf32>
    %c0_68 = arith.constant 0 : index
    %c0_69 = arith.constant 0 : index
    %228 = vector.load %arg4[%c0_68, %c0_69] : memref<128x384xf32, #tpu.memory_space<vmem>>, vector<128x384xf32>
    %cst_70 = arith.constant dense<0.000000e+00> : vector<8x384xf32>
    %229 = tpu.matmul %221, %228, %cst_70 {dimension_numbers = #tpu.dot_dimension_numbers<[1], [0], [0], [1], [0, 0, 1, 1], [], []>} : vector<8x128xf32>, vector<128x384xf32>, vector<8x384xf32> -> vector<8x384xf32>
    %230 = vector.extract_strided_slice %227 {offsets = [0, 0], sizes = [8, 128], strides = [1, 1]} : vector<8x384xf32> to vector<8x128xf32>
    %231 = vector.extract_strided_slice %229 {offsets = [0, 0], sizes = [8, 128], strides = [1, 1]} : vector<8x384xf32> to vector<8x128xf32>
    %232 = arith.addf %230, %231 : vector<8x128xf32>
    %233 = arith.negf %232 : vector<8x128xf32>
    %234 = math.exp %233 : vector<8x128xf32>
    %cst_71 = arith.constant 1.000000e+00 : f32
    %235 = vector.broadcast %cst_71 : f32 to vector<8x128xf32>
    %236 = arith.addf %235, %234 : vector<8x128xf32>
    %237 = arith.divf %235, %236 : vector<8x128xf32>
    %238 = vector.extract_strided_slice %227 {offsets = [0, 128], sizes = [8, 128], strides = [1, 1]} : vector<8x384xf32> to vector<8x128xf32>
    %239 = vector.extract_strided_slice %229 {offsets = [0, 128], sizes = [8, 128], strides = [1, 1]} : vector<8x384xf32> to vector<8x128xf32>
    %240 = arith.addf %238, %239 : vector<8x128xf32>
    %241 = arith.negf %240 : vector<8x128xf32>
    %242 = math.exp %241 : vector<8x128xf32>
    %cst_72 = arith.constant 1.000000e+00 : f32
    %243 = vector.broadcast %cst_72 : f32 to vector<8x128xf32>
    %244 = arith.addf %243, %242 : vector<8x128xf32>
    %245 = arith.divf %243, %244 : vector<8x128xf32>
    %246 = vector.extract_strided_slice %227 {offsets = [0, 256], sizes = [8, 128], strides = [1, 1]} : vector<8x384xf32> to vector<8x128xf32>
    %247 = vector.extract_strided_slice %229 {offsets = [0, 256], sizes = [8, 128], strides = [1, 1]} : vector<8x384xf32> to vector<8x128xf32>
    %248 = arith.addf %247, %12 : vector<8x128xf32>
    %249 = arith.mulf %237, %248 : vector<8x128xf32>
    %250 = arith.addf %246, %249 : vector<8x128xf32>
    %251 = math.tanh %250 : vector<8x128xf32>
    %cst_73 = arith.constant 1.000000e+00 : f32
    %252 = vector.broadcast %cst_73 : f32 to vector<8x128xf32>
    %253 = arith.subf %252, %245 : vector<8x128xf32>
    %254 = arith.mulf %253, %251 : vector<8x128xf32>
    %255 = arith.mulf %245, %221 : vector<8x128xf32>
    %256 = arith.addf %254, %255 : vector<8x128xf32>
    %257 = arith.index_cast %225 : i32 to index
    %c0_74 = arith.constant 0 : index
    %258 = vector.load %arg13[%257, %c0_74] : memref<64x128xf32, #tpu.memory_space<vmem>>, vector<8x128xf32>
    tpu.vector_store %arg13[%257, %c0_74], %256 {strides = array<i32>} : memref<64x128xf32, #tpu.memory_space<vmem>>, vector<8x128xf32>,
    %c7_i32 = arith.constant 7 : i32
    %c8_i32_75 = arith.constant 8 : i32
    %259 = arith.muli %c7_i32, %c8_i32_75 : i32
    %260 = tpu.assume_multiple %259, 8 : i32
    %261 = arith.index_cast %260 : i32 to index
    %c0_76 = arith.constant 0 : index
    %262 = vector.load %arg12[%261, %c0_76] : memref<64x384xf32, #tpu.memory_space<vmem>>, vector<8x384xf32>
    %c0_77 = arith.constant 0 : index
    %c0_78 = arith.constant 0 : index
    %263 = vector.load %arg4[%c0_77, %c0_78] : memref<128x384xf32, #tpu.memory_space<vmem>>, vector<128x384xf32>
    %cst_79 = arith.constant dense<0.000000e+00> : vector<8x384xf32>
    %264 = tpu.matmul %256, %263, %cst_79 {dimension_numbers = #tpu.dot_dimension_numbers<[1], [0], [0], [1], [0, 0, 1, 1], [], []>} : vector<8x128xf32>, vector<128x384xf32>, vector<8x384xf32> -> vector<8x384xf32>
    %265 = vector.extract_strided_slice %262 {offsets = [0, 0], sizes = [8, 128], strides = [1, 1]} : vector<8x384xf32> to vector<8x128xf32>
    %266 = vector.extract_strided_slice %264 {offsets = [0, 0], sizes = [8, 128], strides = [1, 1]} : vector<8x384xf32> to vector<8x128xf32>
    %267 = arith.addf %265, %266 : vector<8x128xf32>
    %268 = arith.negf %267 : vector<8x128xf32>
    %269 = math.exp %268 : vector<8x128xf32>
    %cst_80 = arith.constant 1.000000e+00 : f32
    %270 = vector.broadcast %cst_80 : f32 to vector<8x128xf32>
    %271 = arith.addf %270, %269 : vector<8x128xf32>
    %272 = arith.divf %270, %271 : vector<8x128xf32>
    %273 = vector.extract_strided_slice %262 {offsets = [0, 128], sizes = [8, 128], strides = [1, 1]} : vector<8x384xf32> to vector<8x128xf32>
    %274 = vector.extract_strided_slice %264 {offsets = [0, 128], sizes = [8, 128], strides = [1, 1]} : vector<8x384xf32> to vector<8x128xf32>
    %275 = arith.addf %273, %274 : vector<8x128xf32>
    %276 = arith.negf %275 : vector<8x128xf32>
    %277 = math.exp %276 : vector<8x128xf32>
    %cst_81 = arith.constant 1.000000e+00 : f32
    %278 = vector.broadcast %cst_81 : f32 to vector<8x128xf32>
    %279 = arith.addf %278, %277 : vector<8x128xf32>
    %280 = arith.divf %278, %279 : vector<8x128xf32>
    %281 = vector.extract_strided_slice %262 {offsets = [0, 256], sizes = [8, 128], strides = [1, 1]} : vector<8x384xf32> to vector<8x128xf32>
    %282 = vector.extract_strided_slice %264 {offsets = [0, 256], sizes = [8, 128], strides = [1, 1]} : vector<8x384xf32> to vector<8x128xf32>
    %283 = arith.addf %282, %12 : vector<8x128xf32>
    %284 = arith.mulf %272, %283 : vector<8x128xf32>
    %285 = arith.addf %281, %284 : vector<8x128xf32>
    %286 = math.tanh %285 : vector<8x128xf32>
    %cst_82 = arith.constant 1.000000e+00 : f32
    %287 = vector.broadcast %cst_82 : f32 to vector<8x128xf32>
    %288 = arith.subf %287, %280 : vector<8x128xf32>
    %289 = arith.mulf %288, %286 : vector<8x128xf32>
    %290 = arith.mulf %280, %256 : vector<8x128xf32>
    %291 = arith.addf %289, %290 : vector<8x128xf32>
    %292 = arith.index_cast %260 : i32 to index
    %c0_83 = arith.constant 0 : index
    %293 = vector.load %arg13[%292, %c0_83] : memref<64x128xf32, #tpu.memory_space<vmem>>, vector<8x128xf32>
    tpu.vector_store %arg13[%292, %c0_83], %291 {strides = array<i32>} : memref<64x128xf32, #tpu.memory_space<vmem>>, vector<8x128xf32>,
    %c8_i32_84 = arith.constant 8 : i32
    %c0_85 = arith.constant 0 : index
    %c0_86 = arith.constant 0 : index
    %294 = vector.load %arg11[%c0_85, %c0_86] : memref<8x128xf32, #tpu.memory_space<vmem>>, vector<8x128xf32>
    tpu.vector_store %arg11[%c0_85, %c0_86], %291 {strides = array<i32>} : memref<8x128xf32, #tpu.memory_space<vmem>>, vector<8x128xf32>,
    %c0_i32_87 = arith.constant 0 : i32
    %295 = arith.cmpi eq, %arg0, %c0_i32_87 : i32
    %296 = arith.extui %295 : i1 to i32
    %c0_i32_88 = arith.constant 0 : i32
    %297 = arith.cmpi ne, %296, %c0_i32_88 : i32
    scf.if %297 {
      %c0_100 = arith.constant 0 : index
      %c0_101 = arith.constant 0 : index
      %316 = vector.load %arg13[%c0_100, %c0_101] : memref<64x128xf32, #tpu.memory_space<vmem>>, vector<8x128xf32>
      %c0_102 = arith.constant 0 : index
      %c0_103 = arith.constant 0 : index
      %317 = vector.load %arg10[%c0_102, %c0_103] : memref<8x128xf32, #tpu.memory_space<vmem>>, vector<8x128xf32>
      tpu.vector_store %arg10[%c0_102, %c0_103], %316 {strides = array<i32>} : memref<8x128xf32, #tpu.memory_space<vmem>>, vector<8x128xf32>,
    } else {
    }
    %c0_89 = arith.constant 0 : index
    %c0_90 = arith.constant 0 : index
    %298 = vector.load %arg13[%c0_89, %c0_90] : memref<64x128xf32, #tpu.memory_space<vmem>>, vector<64x128xf32>
    %c0_91 = arith.constant 0 : index
    %c0_92 = arith.constant 0 : index
    %299 = vector.load %arg7[%c0_91, %c0_92] : memref<128x128xf32, #tpu.memory_space<vmem>>, vector<128x128xf32>
    %cst_93 = arith.constant dense<0.000000e+00> : vector<64x128xf32>
    %300 = tpu.matmul %298, %299, %cst_93 {dimension_numbers = #tpu.dot_dimension_numbers<[1], [0], [0], [1], [0, 0, 1, 1], [], []>} : vector<64x128xf32>, vector<128x128xf32>, vector<64x128xf32> -> vector<64x128xf32>
    %c0_94 = arith.constant 0 : index
    %c0_95 = arith.constant 0 : index
    %301 = vector.load %arg8[%c0_94, %c0_95] : memref<1x128xf32, #tpu.memory_space<vmem>>, vector<1x128xf32>
    %302 = vector.broadcast %301 : vector<1x128xf32> to vector<64x128xf32>
    %303 = arith.addf %300, %302 : vector<64x128xf32>
    %cst_96 = arith.constant dense<0xFF800000> : vector<64xf32>
    %304 = vector.multi_reduction <maximumf>, %303, %cst_96 [1] : vector<64x128xf32> to vector<64xf32>
    %305 = vector.shape_cast %304 : vector<64xf32> to vector<64x1xf32>
    %306 = vector.broadcast %305 : vector<64x1xf32> to vector<64x128xf32>
    %307 = arith.subf %303, %306 : vector<64x128xf32>
    %308 = math.exp %307 : vector<64x128xf32>
    %cst_97 = arith.constant dense<0.000000e+00> : vector<64xf32>
    %309 = vector.multi_reduction <add>, %308, %cst_97 [1] : vector<64x128xf32> to vector<64xf32>
    %310 = vector.shape_cast %309 : vector<64xf32> to vector<64x1xf32>
    %311 = math.log %310 : vector<64x1xf32>
    %312 = arith.addf %311, %305 : vector<64x1xf32>
    %313 = vector.broadcast %312 : vector<64x1xf32> to vector<64x128xf32>
    %314 = arith.subf %303, %313 : vector<64x128xf32>
    %c0_98 = arith.constant 0 : index
    %c0_99 = arith.constant 0 : index
    %315 = vector.load %arg9[%c0_98, %c0_99] : memref<64x128xf32, #tpu.memory_space<vmem>>, vector<64x128xf32>
    tpu.vector_store %arg9[%c0_98, %c0_99], %314 {strides = array<i32>} : memref<64x128xf32, #tpu.memory_space<vmem>>, vector<64x128xf32>,
    return
  }
  func.func @transform_0(%arg0: i32) -> (i32, i32) {
    %c0_i32 = arith.constant 0 : i32
    %c0_i32_0 = arith.constant 0 : i32
    return %arg0, %c0_i32 : i32, i32
  }
  func.func @transform_1(%arg0: i32) -> (i32, i32) {
    %c0_i32 = arith.constant 0 : i32
    %c0_i32_0 = arith.constant 0 : i32
    %c0_i32_1 = arith.constant 0 : i32
    return %c0_i32, %c0_i32_0 : i32, i32
  }
  func.func @transform_2(%arg0: i32) -> (i32, i32) {
    %c0_i32 = arith.constant 0 : i32
    %c0_i32_0 = arith.constant 0 : i32
    %c0_i32_1 = arith.constant 0 : i32
    return %c0_i32, %c0_i32_0 : i32, i32
  }
  func.func @transform_3(%arg0: i32) -> (i32, i32) {
    %c0_i32 = arith.constant 0 : i32
    %c0_i32_0 = arith.constant 0 : i32
    %c0_i32_1 = arith.constant 0 : i32
    return %c0_i32, %c0_i32_0 : i32, i32
  }
  func.func @transform_4(%arg0: i32) -> (i32, i32) {
    %c0_i32 = arith.constant 0 : i32
    %c0_i32_0 = arith.constant 0 : i32
    %c0_i32_1 = arith.constant 0 : i32
    return %c0_i32, %c0_i32_0 : i32, i32
  }
  func.func @transform_5(%arg0: i32) -> (i32, i32) {
    %c0_i32 = arith.constant 0 : i32
    %c0_i32_0 = arith.constant 0 : i32
    %c0_i32_1 = arith.constant 0 : i32
    return %c0_i32, %c0_i32_0 : i32, i32
  }
  func.func @transform_6(%arg0: i32) -> (i32, i32) {
    %c0_i32 = arith.constant 0 : i32
    %c0_i32_0 = arith.constant 0 : i32
    %c0_i32_1 = arith.constant 0 : i32
    return %c0_i32, %c0_i32_0 : i32, i32
  }
  func.func @transform_7(%arg0: i32) -> (i32, i32) {
    %c0_i32 = arith.constant 0 : i32
    %c0_i32_0 = arith.constant 0 : i32
    %c0_i32_1 = arith.constant 0 : i32
    return %c0_i32, %c0_i32_0 : i32, i32
  }
  func.func @transform_8(%arg0: i32) -> (i32, i32) {
    %c0_i32 = arith.constant 0 : i32
    %c0_i32_0 = arith.constant 0 : i32
    return %arg0, %c0_i32 : i32, i32
  }
  func.func @transform_9(%arg0: i32) -> (i32, i32) {
    %c0_i32 = arith.constant 0 : i32
    %c0_i32_0 = arith.constant 0 : i32
    %c0_i32_1 = arith.constant 0 : i32
    return %c0_i32, %c0_i32_0 : i32, i32
  }
}

</mosaic_0001>

<bundles_post_ra>
// kernel: tpu_custom_call.1
= control target key start
LH: loop header
LB: loop body
LE: loop exit
PB: predicated region body
PF: predicated region fallthrough
CT: control target
= control target key end

     0   :  { %15 = vsyncpa [#allocation6], 0  ;;  %s4641_s0 = inlined_call_operand.hbm [shape: f32[64,128], index: 0, kind: input, shape index: {}]   ;;  %s4642_s1 = inlined_call_operand.hbm [shape: f32[8,128], index: 1, kind: input, shape index: {}]   ;;  %s4643_s2 = inlined_call_operand.hbm [shape: f32[128,384], index: 2, kind: input, shape index: {}]   ;;  %s4644_s3 = inlined_call_operand.hbm [shape: f32[128,384], index: 3, kind: input, shape index: {}]   ;;  %s4645_s4 = inlined_call_operand.vmem [shape: f32[1,384], index: 4, kind: input, shape index: {}]   ;;  %s4646_s5 = inlined_call_operand.vmem [shape: f32[1,128], index: 5, kind: input, shape index: {}]   ;;  %s4647_s6 = inlined_call_operand.hbm [shape: f32[128,128], index: 6, kind: input, shape index: {}]   ;;  %s4648_s7 = inlined_call_operand.vmem [shape: f32[1,128], index: 7, kind: input, shape index: {}]   ;;  %s4649_s8 = inlined_call_operand.hbm [shape: f32[64,128], index: 8, kind: output, shape index: {0}]   ;;  %s4650_s9 = inlined_call_operand.hbm [shape: f32[8,128], index: 9, kind: output, shape index: {1}]  }
   0x1   :  { %16 = vsyncpa [#allocation9], 0 }
   0x2   :  { %17 = vsyncpa [#allocation12], 0 }
   0x3   :  { %18 = vsyncpa [#allocation7], 0 }
   0x4   :  { %19 = vsyncpa [#allocation16], 0  ;;  %s3894_s30 = smov [#allocation8]   ;;  %s3730_s13 = scalar_lea.hbm %s4642_s1, 128 }
   0x5   :  { %s38_s10 = sshll.u32 %s3894_s30, 4  ;;  %p3731_p0 = scmp.ne.s32.totalorder %s4642_s1, %s3730_s13  ;;  %s39_s10 = int_to_ptr.vmem [resolvable:$true] %s38_s10 }
   0x6   :  { %p3734_p1 = scmp.lt.u32.totalorder %s3730_s13, %s4642_s1 }
   0x8   :  { %p3736_p2 = pnand %p3734_p1, %p3731_p0 }
   0xa   :  { %3739 = shalt.err (!%p3736_p2)
}
   0xb   :  { %s3740_s18 = scalar_lea.vmem %s39_s10, 128  ;;  %p3745_p4 = scmp.lt.s32.totalorder %s39_s10, %s39_s10 }
   0xc   :  { %p3741_p3 = scmp.ne.s32.totalorder %s39_s10, %s3740_s18  ;;  %p3746_p5 = scmp.lt.s32.totalorder %s3740_s18, %s3740_s18 }
   0xe   :  { %p3747_p6 = por %p3746_p5, %p3745_p4 }
  0x10   :  { %p3748_p7 = pnand %p3747_p6, %p3741_p3 }
  0x12   :  { %3751 = shalt.err (!%p3748_p7)
}
  0x13   :  { %41 = dma.hbm_to_vmem [thread:$0]  %s4642_s1, 128, %s39_s10, [#allocation9]  }
  0x14   :  { %s3895_s21 = smov [#allocation11]   ;;  %s3896_s23 = smov [#allocation5]  }
  0x15   :  { %s59_s22 = sshll.u32 %s3895_s21, 4  ;;  %s25_s24 = sshll.u32 %s3896_s23, 4  ;;  %s60_s22 = int_to_ptr.vmem [resolvable:$true] %s59_s22  ;;  %s26_s24 = int_to_ptr.vmem [resolvable:$true] %s25_s24 }
  0x16   :  { %s3752_s27 = scalar_lea.hbm %s4644_s3, 6144 }
  0x17   :  { %p3753_p8 = scmp.ne.s32.totalorder %s4644_s3, %s3752_s27  ;;  %p3756_p9 = scmp.lt.u32.totalorder %s3752_s27, %s4644_s3 }
  0x19   :  { %p3758_p10 = pnand %p3756_p9, %p3753_p8 }
  0x1b   :  { %3761 = shalt.err (!%p3758_p10)
}
  0x1c   :  { %s3762_s1 = scalar_lea.vmem %s60_s22, 6144  ;;  %p3767_p12 = scmp.lt.s32.totalorder %s60_s22, %s60_s22 }
  0x1d   :  { %p3763_p11 = scmp.ne.s32.totalorder %s60_s22, %s3762_s1  ;;  %p3768_p13 = scmp.lt.s32.totalorder %s3762_s1, %s3762_s1 }
  0x1f   :  { %p3769_p0 = por %p3768_p13, %p3767_p12 }
  0x21   :  { %p3770_p1 = pnand %p3769_p0, %p3763_p11 }
  0x23   :  { %3773 = shalt.err (!%p3770_p1)
}
  0x24   :  { %s3897_s10 = smov 384   ;;  %s3898_s12 = smov 24  }
  0x25   :  { %65 = dma.hbm_to_vmem [thread:$0]  %s4644_s3, 6144, %s60_s22, [#allocation12], %s3897_s10, %s3897_s10, %s3898_s12  }
  0x26   :  { %s3774_s17 = scalar_lea.hbm %s4641_s0, 1024 }
  0x27   :  { %p3775_p2 = scmp.ne.s32.totalorder %s4641_s0, %s3774_s17  ;;  %p3778_p3 = scmp.lt.u32.totalorder %s3774_s17, %s4641_s0 }
  0x29   :  { %p3780_p4 = pnand %p3778_p3, %p3775_p2 }
  0x2b   :  { %3783 = shalt.err (!%p3780_p4)
}
  0x2c   :  { %s3784_s23 = scalar_lea.vmem %s26_s24, 1024  ;;  %p3789_p6 = scmp.lt.s32.totalorder %s26_s24, %s26_s24 }
  0x2d   :  { %p3785_p5 = scmp.ne.s32.totalorder %s26_s24, %s3784_s23  ;;  %p3790_p7 = scmp.lt.s32.totalorder %s3784_s23, %s3784_s23 }
  0x2f   :  { %p3791_p8 = por %p3790_p7, %p3789_p6 }
  0x31   :  { %p3792_p9 = pnand %p3791_p8, %p3785_p5 }
  0x33   :  { %3795 = shalt.err (!%p3792_p9)
}
  0x34   :  { %s3899_s3 = smov 128   ;;  %s3900_s22 = smov 8  }
  0x35   :  { %31 = dma.hbm_to_vmem [thread:$0]  %s4641_s0, 1024, %s26_s24, [#allocation6], %s3899_s3, %s3899_s3, %s3900_s22  }
  0x36   :  { %s3901_s27 = smov [#allocation10]   ;;  %s3902_s29 = smov [#allocation13]  }
  0x37   :  { %s47_s28 = sshll.u32 %s3901_s27, 4  ;;  %s75_s30 = sshll.u32 %s3902_s29, 4  ;;  %s48_s28 = int_to_ptr.vmem [resolvable:$true] %s47_s28  ;;  %s76_s30 = int_to_ptr.vmem [resolvable:$true] %s75_s30 }
  0x38   :  { %s3796_s13 = scalar_lea.hbm %s4643_s2, 6144 }
  0x39   :  { %p3797_p10 = scmp.ne.s32.totalorder %s4643_s2, %s3796_s13  ;;  %p3800_p11 = scmp.lt.u32.totalorder %s3796_s13, %s4643_s2 }
  0x3b   :  { %p3802_p12 = pnand %p3800_p11, %p3797_p10 }
  0x3d   :  { %3805 = shalt.err (!%p3802_p12)
}
  0x3e   :  { %s3806_s0 = scalar_lea.vmem %s48_s28, 6144  ;;  %p3811_p0 = scmp.lt.s32.totalorder %s48_s28, %s48_s28 }
  0x3f   :  { %p3807_p13 = scmp.ne.s32.totalorder %s48_s28, %s3806_s0  ;;  %p3812_p1 = scmp.lt.s32.totalorder %s3806_s0, %s3806_s0 }
  0x41   :  { %p3813_p2 = por %p3812_p1, %p3811_p0 }
  0x43   :  { %p3814_p3 = pnand %p3813_p2, %p3807_p13 }
  0x45   :  { %3817 = shalt.err (!%p3814_p3)
}
  0x46   :  { %53 = dma.hbm_to_vmem [thread:$0]  %s4643_s2, 6144, %s48_s28, [#allocation9], %s3897_s10, %s3897_s10, %s3898_s12  }
  0x47   :  { %s3818_s21 = scalar_lea.hbm %s4647_s6, 2048 }
  0x48   :  { %p3819_p4 = scmp.ne.s32.totalorder %s4647_s6, %s3818_s21  ;;  %p3822_p5 = scmp.lt.u32.totalorder %s3818_s21, %s4647_s6 }
  0x4a   :  { %p3824_p6 = pnand %p3822_p5, %p3819_p4 }
  0x4c   :  { %3827 = shalt.err (!%p3824_p6)
}
  0x4d   :  { %s3828_s29 = scalar_lea.vmem %s76_s30, 2048  ;;  %p3833_p8 = scmp.lt.s32.totalorder %s76_s30, %s76_s30 }
  0x4e   :  { %p3829_p7 = scmp.ne.s32.totalorder %s76_s30, %s3828_s29  ;;  %p3834_p9 = scmp.lt.s32.totalorder %s3828_s29, %s3828_s29 }
  0x50   :  { %p3835_p10 = por %p3834_p9, %p3833_p8 }
  0x52   :  { %p3836_p11 = pnand %p3835_p10, %p3829_p7 }
  0x54   :  { %3839 = shalt.err (!%p3836_p11)
}
  0x55   :  { %81 = dma.hbm_to_vmem [thread:$0]  %s4647_s6, 2048, %s76_s30, [#allocation12], %s3899_s3, %s3899_s3, %s3900_s22  }
  0x56   :  { %3884 = dma.done.wait [#allocation6], 1024  }
  0x57   :  { %3885 = vsyncadd [#allocation6], 4294966272 }
  0x58   :  { %3886 = dma.done.wait [#allocation9], 6272  }
  0x59   :  { %3887 = vsyncadd [#allocation9], 4294961024 }
  0x5a   :  { %3888 = dma.done.wait [#allocation12], 8192  }
  0x5b   :  { %3889 = vsyncadd [#allocation12], 4294959104  ;;  %v4651_v0 = vmov 0.0   ;;  %v114_v1 = vld [vmem:[#allocation10 + $0x8] sm:$0xff]  ;;  %v117_v2 = vld [vmem:[#allocation10 + $0x20] sm:$0xff]  ;;  %vm3905_vm0 = vmmov 0  }
  0x5c   :  { %242 = vmatprep.mubr.f32.mxu1 %v4651_v0  ;;  %546 = vmatprep.mubr.f32.mxu0 %v4651_v0  ;;  %v113_v3 = vld [vmem:[#allocation10] sm:$0xff]  ;;  %v3027_v4 = vpack.c.bf16 %v117_v2, %v114_v1  ;;  %v116_v5 = vld [vmem:[#allocation10 + $0x18] sm:$0xff]  ;;  %v435_v6 = vld [vmem:[#allocation11 + $0x8] sm:$0xff] }
  0x5d   :  { %v438_v7 = vld [vmem:[#allocation11 + $0x20] sm:$0xff]  ;;  %v3029_v8 = vpack.c.bf16 %v116_v5, %v113_v3  ;;  %v437_v11 = vld [vmem:[#allocation11 + $0x18] sm:$0xff]  ;;  %v123_v14 = vld [vmem:[#allocation10 + $0x50] sm:$0xff] }
  0x5e   :  { %v4032_v9 = vpack.c.bf16 %v438_v7, %v435_v6  ;;  %v434_v10 = vld [vmem:[#allocation11] sm:$0xff]  ;;  %v120_v12 = vld [vmem:[#allocation10 + $0x38] sm:$0xff]  ;;  %3028 = vmatprep.subr.bf16.mxu1 %v3027_v4  ;;  %v119_v15 = vld [vmem:[#allocation10 + $0x30] sm:$0xff] }
  0x5f   :  { %v4034_v13 = vpack.c.bf16 %v437_v11, %v434_v10  ;;  %v122_v16 = vld [vmem:[#allocation10 + $0x48] sm:$0xff]  ;;  %3030 = vmatpush1.bf16.msra.mxu1 %v3029_v8  ;;  %v3031_v17 = vpack.c.bf16 %v123_v14, %v120_v12  ;;  %v441_v19 = vld [vmem:[#allocation11 + $0x38] sm:$0xff]  ;;  %v444_v20 = vld [vmem:[#allocation11 + $0x50] sm:$0xff] }
  0x60   :  { %3092 = vmatprep.subr.bf16.mxu0 %v4032_v9  ;;  %v3033_v18 = vpack.c.bf16 %v122_v16, %v119_v15  ;;  %v440_v21 = vld [vmem:[#allocation11 + $0x30] sm:$0xff]  ;;  %v4038_v22 = vpack.c.bf16 %v444_v20, %v441_v19  ;;  %v443_v23 = vld [vmem:[#allocation11 + $0x48] sm:$0xff]  ;;  %v129_v25 = vld [vmem:[#allocation10 + $0x80] sm:$0xff] }
  0x61   :  { %3094 = vmatpush1.bf16.msra.mxu0 %v4034_v13  ;;  %v126_v24 = vld [vmem:[#allocation10 + $0x68] sm:$0xff]  ;;  %3032 = vmatprep.subr.bf16.mxu1 %v3031_v17  ;;  %v4040_v26 = vpack.c.bf16 %v443_v23, %v440_v21  ;;  %v125_v28 = vld [vmem:[#allocation10 + $0x60] sm:$0xff]  ;;  %v128_v29 = vld [vmem:[#allocation10 + $0x78] sm:$0xff] }
  0x62   :  { %v3035_v27 = vpack.c.bf16 %v129_v25, %v126_v24  ;;  %v447_v30 = vld [vmem:[#allocation11 + $0x68] sm:$0xff]  ;;  %3096 = vmatprep.subr.bf16.mxu0 %v4038_v22  ;;  %v450_v31 = vld [vmem:[#allocation11 + $0x80] sm:$0xff]  ;;  %v449_v33 = vld [vmem:[#allocation11 + $0x78] sm:$0xff]  ;;  %v3037_v34 = vpack.c.bf16 %v128_v29, %v125_v28 }
  0x63   :  { %v446_v32 = vld [vmem:[#allocation11 + $0x60] sm:$0xff]  ;;  %3034 = vmatpush1.bf16.msra.mxu1 %v3033_v18  ;;  %v4043_v35 = vpack.c.bf16 %v450_v31, %v447_v30  ;;  %v132_v36 = vld [vmem:[#allocation10 + $0x98] sm:$0xff]  ;;  %v135_v37 = vld [vmem:[#allocation10 + $0xb0] sm:$0xff] }
  0x64   :  { %v131_v38 = vld [vmem:[#allocation10 + $0x90] sm:$0xff]  ;;  %3036 = vmatprep.subr.bf16.mxu1 %v3035_v27  ;;  %v4046_v39 = vpack.c.bf16 %v449_v33, %v446_v32  ;;  %v3039_v40 = vpack.c.bf16 %v135_v37, %v132_v36  ;;  %v134_v41 = vld [vmem:[#allocation10 + $0xa8] sm:$0xff]  ;;  %v453_v42 = vld [vmem:[#allocation11 + $0x98] sm:$0xff] }
  0x65   :  { %3098 = vmatpush1.bf16.msra.mxu0 %v4040_v26  ;;  %v456_v43 = vld [vmem:[#allocation11 + $0xb0] sm:$0xff]  ;;  %v455_v46 = vld [vmem:[#allocation11 + $0xa8] sm:$0xff]  ;;  %v141_v48 = vld [vmem:[#allocation10 + $0xe0] sm:$0xff]  ;;  %v3041_v49 = vpack.c.bf16 %v134_v41, %v131_v38 }
  0x66   :  { %3100 = vmatprep.subr.bf16.mxu0 %v4043_v35  ;;  %v4049_v44 = vpack.c.bf16 %v456_v43, %v453_v42  ;;  %v452_v45 = vld [vmem:[#allocation11 + $0x90] sm:$0xff]  ;;  %v138_v47 = vld [vmem:[#allocation10 + $0xc8] sm:$0xff]  ;;  %v462_v51 = vld [vmem:[#allocation11 + $0xe0] sm:$0xff] }
  0x67   :  { %3038 = vmatpush1.bf16.msra.mxu1 %v3037_v34  ;;  %v459_v50 = vld [vmem:[#allocation11 + $0xc8] sm:$0xff]  ;;  %v4052_v52 = vpack.c.bf16 %v455_v46, %v452_v45  ;;  %v3043_v53 = vpack.c.bf16 %v141_v48, %v138_v47  ;;  %v137_v54 = vld [vmem:[#allocation10 + $0xc0] sm:$0xff]  ;;  %v140_v55 = vld [vmem:[#allocation10 + $0xd8] sm:$0xff] }
  0x68   :  { %3040 = vmatprep.subr.bf16.mxu1 %v3039_v40  ;;  %v458_v56 = vld [vmem:[#allocation11 + $0xc0] sm:$0xff]  ;;  %v4055_v57 = vpack.c.bf16 %v462_v51, %v459_v50  ;;  %v461_v58 = vld [vmem:[#allocation11 + $0xd8] sm:$0xff]  ;;  %v147_v60 = vld [vmem:[#allocation10 + $0x110] sm:$0xff]  ;;  %v3045_v63 = vpack.c.bf16 %v140_v55, %v137_v54 }
  0x69   :  { %3102 = vmatpush1.bf16.msra.mxu0 %v4046_v39  ;;  %v144_v59 = vld [vmem:[#allocation10 + $0xf8] sm:$0xff]  ;;  %v468_v62 = vld [vmem:[#allocation11 + $0x110] sm:$0xff]  ;;  %v4058_v1 = vpack.c.bf16 %v461_v58, %v458_v56  ;;  %v146_v4 = vld [vmem:[#allocation10 + $0x108] sm:$0xff] }
  0x6a   :  { %3104 = vmatprep.subr.bf16.mxu0 %v4049_v44  ;;  %v465_v61 = vld [vmem:[#allocation11 + $0xf8] sm:$0xff]  ;;  %v3047_v2 = vpack.c.bf16 %v147_v60, %v144_v59  ;;  %v143_v3 = vld [vmem:[#allocation10 + $0xf0] sm:$0xff]  ;;  %v467_v7 = vld [vmem:[#allocation11 + $0x108] sm:$0xff] }
  0x6b   :  { %3042 = vmatpush1.bf16.msra.mxu1 %v3041_v49  ;;  %v464_v5 = vld [vmem:[#allocation11 + $0xf0] sm:$0xff]  ;;  %v4061_v6 = vpack.c.bf16 %v468_v62, %v465_v61  ;;  %v150_v8 = vld [vmem:[#allocation10 + $0x128] sm:$0xff]  ;;  %v153_v10 = vld [vmem:[#allocation10 + $0x140] sm:$0xff]  ;;  %v3049_v14 = vpack.c.bf16 %v146_v4, %v143_v3 }
  0x6c   :  { %3044 = vmatprep.subr.bf16.mxu1 %v3043_v53  ;;  %v471_v11 = vld [vmem:[#allocation11 + $0x128] sm:$0xff]  ;;  %v474_v12 = vld [vmem:[#allocation11 + $0x140] sm:$0xff]  ;;  %v4064_v15 = vpack.c.bf16 %v467_v7, %v464_v5  ;;  %v3051_v16 = vpack.c.bf16 %v153_v10, %v150_v8  ;;  %v152_v18 = vld [vmem:[#allocation10 + $0x138] sm:$0xff] }
  0x6d   :  { %3106 = vmatpush1.bf16.msra.mxu0 %v4052_v52  ;;  %v149_v17 = vld [vmem:[#allocation10 + $0x120] sm:$0xff]  ;;  %v4067_v20 = vpack.c.bf16 %v474_v12, %v471_v11  ;;  %v473_v21 = vld [vmem:[#allocation11 + $0x138] sm:$0xff]  ;;  %v159_v24 = vld [vmem:[#allocation10 + $0x170] sm:$0xff] }
  0x6e   :  { %3108 = vmatprep.subr.bf16.mxu0 %v4055_v57  ;;  %v470_v19 = vld [vmem:[#allocation11 + $0x120] sm:$0xff]  ;;  %v156_v23 = vld [vmem:[#allocation10 + $0x158] sm:$0xff]  ;;  %v480_v27 = vld [vmem:[#allocation11 + $0x170] sm:$0xff]  ;;  %v3053_v28 = vpack.c.bf16 %v152_v18, %v149_v17 }
  0x6f   :  { %3046 = vmatpush1.bf16.msra.mxu1 %v3045_v63  ;;  %v477_v25 = vld [vmem:[#allocation11 + $0x158] sm:$0xff]  ;;  %v4070_v29 = vpack.c.bf16 %v473_v21, %v470_v19  ;;  %v3055_v30 = vpack.c.bf16 %v159_v24, %v156_v23  ;;  %v155_v31 = vld [vmem:[#allocation10 + $0x150] sm:$0xff]  ;;  %v158_v32 = vld [vmem:[#allocation10 + $0x168] sm:$0xff]  ;;  %v3904_v23 = vmov 0.0|0.0  }
  0x70   :  { %3048 = vmatprep.subr.bf16.mxu1 %v3047_v2  ;;  %v476_v33 = vld [vmem:[#allocation11 + $0x150] sm:$0xff]  ;;  %v4073_v34 = vpack.c.bf16 %v480_v27, %v477_v25  ;;  %v479_v36 = vld [vmem:[#allocation11 + $0x168] sm:$0xff]  ;;  %v3057_v40 = vpack.c.bf16 %v158_v32, %v155_v31  ;;  %v121_v43 = vld [vmem:[#allocation10 + $0x40] sm:$0xff] }
  0x71   :  { %3110 = vmatpush1.bf16.msra.mxu0 %v4058_v1  ;;  %v115_v37 = vld [vmem:[#allocation10 + $0x10] sm:$0xff]  ;;  %v118_v38 = vld [vmem:[#allocation10 + $0x28] sm:$0xff]  ;;  %v4076_v41 = vpack.c.bf16 %v479_v36, %v476_v33  ;;  %v124_v45 = vld [vmem:[#allocation10 + $0x58] sm:$0xff] }
  0x72   :  { %3112 = vmatprep.subr.bf16.mxu0 %v4061_v6  ;;  %v3059_v42 = vpack.c.bf16 %v118_v38, %v115_v37  ;;  %v4079_v46 = vld [vmem:[#allocation5] sm:$0xff]  ;;  %v3063_v48 = vpack.c.bf16 %v124_v45, %v121_v43  ;;  %v127_v49 = vld [vmem:[#allocation10 + $0x70] sm:$0xff]  ;;  %v130_v50 = vld [vmem:[#allocation10 + $0x88] sm:$0xff] }
  0x73   :  { %3050 = vmatpush1.bf16.msra.mxu1 %v3049_v14  ;;  %v4082_v47 = vld [vmem:[#allocation8] sm:$0xff]  ;;  %v4087_v51 = vld [vmem:[#allocation5 + $0x8] sm:$0xff]  ;;  %v3067_v53 = vpack.c.bf16 %v130_v50, %v127_v49  ;;  %v4095_v56 = vld [vmem:[#allocation5 + $0x10] sm:$0xff] }
  0x74   :  { %3052 = vmatprep.subr.bf16.mxu1 %v3051_v16  ;;  %v133_v54 = vld [vmem:[#allocation10 + $0xa0] sm:$0xff]  ;;  %v136_v55 = vld [vmem:[#allocation10 + $0xb8] sm:$0xff]  ;;  %v139_v59 = vld [vmem:[#allocation10 + $0xd0] sm:$0xff] }
  0x75   :  { %3114 = vmatpush1.bf16.msra.mxu0 %v4064_v15  ;;  %v3071_v58 = vpack.c.bf16 %v136_v55, %v133_v54  ;;  %v142_v60 = vld [vmem:[#allocation10 + $0xe8] sm:$0xff]  ;;  %v108_v61 = vld [vmem:[#allocation5 + $0x18] sm:$0xff]  ;;  %v145_v63 = vld [vmem:[#allocation10 + $0x100] sm:$0xff] }
  0x76   :  { %3116 = vmatprep.subr.bf16.mxu0 %v4067_v20  ;;  %v3075_v62 = vpack.c.bf16 %v142_v60, %v139_v59  ;;  %v148_v2 = vld [vmem:[#allocation10 + $0x118] sm:$0xff]  ;;  %v151_v5 = vld [vmem:[#allocation10 + $0x130] sm:$0xff]  ;;  %v154_v7 = vld [vmem:[#allocation10 + $0x148] sm:$0xff] }
  0x77   :  { %3054 = vmatpush1.bf16.msra.mxu1 %v3053_v28  ;;  %v109_v3 = vld [vmem:[#allocation5 + $0x20] sm:$0xff]  ;;  %v3079_v4 = vpack.c.bf16 %v148_v2, %v145_v63  ;;  %v110_v8 = vld [vmem:[#allocation5 + $0x28] sm:$0xff]  ;;  %v3083_v10 = vpack.c.bf16 %v154_v7, %v151_v5  ;;  %v111_v14 = vld [vmem:[#allocation5 + $0x30] sm:$0xff] }
  0x78   :  { %3056 = vmatprep.subr.bf16.mxu1 %v3055_v30  ;;  %v157_v11 = vld [vmem:[#allocation10 + $0x160] sm:$0xff]  ;;  %v160_v12 = vld [vmem:[#allocation10 + $0x178] sm:$0xff]  ;;  %v112_v17 = vld [vmem:[#allocation5 + $0x38] sm:$0xff] }
  0x79   :  { %3118 = vmatpush1.bf16.msra.mxu0 %v4070_v29  ;;  %v3087_v16 = vpack.c.bf16 %v160_v12, %v157_v11  ;;  %v436_v18 = vld [vmem:[#allocation11 + $0x10] sm:$0xff]  ;;  %v439_v19 = vld [vmem:[#allocation11 + $0x28] sm:$0xff]  ;;  %v442_v24 = vld [vmem:[#allocation11 + $0x40] sm:$0xff] }
  0x7a   :  { %3120 = vmatprep.subr.bf16.mxu0 %v4073_v34  ;;  %v4116_v21 = vpack.c.bf16 %v439_v19, %v436_v18  ;;  %v445_v25 = vld [vmem:[#allocation11 + $0x58] sm:$0xff]  ;;  %v448_v28 = vld [vmem:[#allocation11 + $0x70] sm:$0xff]  ;;  %v451_v30 = vld [vmem:[#allocation11 + $0x88] sm:$0xff] }
  0x7b   :  { %3058 = vmatpush1.bf16.msra.mxu1 %v3057_v40  ;;  %v4123_v27 = vpack.c.bf16 %v445_v25, %v442_v24  ;;  %v4128_v31 = vpack.c.bf16 %v451_v30, %v448_v28  ;;  %v454_v32 = vld [vmem:[#allocation11 + $0xa0] sm:$0xff]  ;;  %v460_v36 = vld [vmem:[#allocation11 + $0xd0] sm:$0xff]  ;;  %v463_v37 = vld [vmem:[#allocation11 + $0xe8] sm:$0xff] }
  0x7c   :  { %3060 = vmatprep.subr.bf16.mxu1 %v3059_v42  ;;  %v4136_v38 = vpack.c.bf16 %v463_v37, %v460_v36  ;;  %v466_v40 = vld [vmem:[#allocation11 + $0x100] sm:$0xff]  ;;  %v472_v45 = vld [vmem:[#allocation11 + $0x130] sm:$0xff]  ;;  %v481_v50 = vld [vmem:[#allocation11 + $0x178] sm:$0xff] }
  0x7d   :  { %3122 = vmatpush1.bf16.msra.mxu0 %v4076_v41  ;;  %v478_v49 = vld [vmem:[#allocation11 + $0x160] sm:$0xff] }
  0x7e   :  { %3148 = vmatprep.subr.bf16.mxu0 %v4032_v9  ;;  %243 = vmatmul.mubr.f32.vlgmr.msra.gmra.mrb[0].mxu1 %v4079_v46 }
  0x7f   :  { %3062 = vmatpush3.bf16.msra.mxu1 %v3059_v42  ;;  %248 = vmatprep.mubr.f32.mxu1 %v4651_v0  ;;  %v469_v42 = vld [vmem:[#allocation11 + $0x118] sm:$0xff] }
  0x80   :  { %547 = vmatmul.mubr.f32.vlgmr.msra.gmra.mrb[0].mxu0 %v4082_v47  ;;  %3064 = vmatprep.subr.bf16.mxu1 %v3063_v48  ;;  %v4142_v43 = vpack.c.bf16 %v469_v42, %v466_v40 }
  0x81   :  { %3150 = vmatpush1.bf16.msra.mxu0 %v4034_v13  ;;  %764 = vmatprep.mubr.f32.mxu0 %v4651_v0 }
  0x82   :  { %249 = vmatmul.mubr.f32.gmra.mrb[2].mxu1 %v4087_v51  ;;  %3152 = vmatprep.subr.bf16.mxu0 %v4038_v22 }
  0x83   :  { %3066 = vmatpush3.bf16.msra.mxu1 %v3063_v48  ;;  %254 = vmatprep.mubr.f32.mxu1 %v4651_v0 }
  0x84   :  { %3068 = vmatprep.subr.bf16.mxu1 %v3067_v53 }
  0x85   :  { %3154 = vmatpush1.bf16.msra.mxu0 %v4040_v26 }
  0x86   :  { %255 = vmatmul.mubr.f32.gmra.mrb[4].mxu1 %v4095_v56  ;;  %3156 = vmatprep.subr.bf16.mxu0 %v4043_v35 }
  0x87   :  { %3070 = vmatpush3.bf16.msra.mxu1 %v3067_v53  ;;  %260 = vmatprep.mubr.f32.mxu1 %v4651_v0  ;;  %v163_v53 = vlaneseq }
  0x88   :  { %3072 = vmatprep.subr.bf16.mxu1 %v3071_v58 }
  0x89   :  { %3158 = vmatpush1.bf16.msra.mxu0 %v4046_v39  ;;  %v164_v54 = vshrl.u32 %v163_v53, 7 }
  0x8a   :  { %261 = vmatmul.mubr.f32.gmra.mrb[6].mxu1 %v108_v61  ;;  %3160 = vmatprep.subr.bf16.mxu0 %v4049_v44 }
  0x8b   :  { %3074 = vmatpush3.bf16.msra.mxu1 %v3071_v58  ;;  %266 = vmatprep.mubr.f32.mxu1 %v4651_v0  ;;  %v165_v55 = vsub.s32 0, %v164_v54  ;;  %v169_v58 = vsub.s32 1, %v164_v54  ;;  %v173_v53 = vsub.s32 2, %v164_v54 }
  0x8c   :  { %3076 = vmatprep.subr.bf16.mxu1 %v3075_v62 }
  0x8d   :  { %3162 = vmatpush1.bf16.msra.mxu0 %v4052_v52 }
  0x8e   :  { %267 = vmatmul.mubr.f32.gmra.mrb[8].mxu1 %v109_v3  ;;  %3164 = vmatprep.subr.bf16.mxu0 %v4055_v57 }
  0x8f   :  { %3078 = vmatpush3.bf16.msra.mxu1 %v3075_v62  ;;  %272 = vmatprep.mubr.f32.mxu1 %v4651_v0 }
  0x90   :  { %3080 = vmatprep.subr.bf16.mxu1 %v3079_v4 }
  0x91   :  { %3166 = vmatpush1.bf16.msra.mxu0 %v4058_v1 }
  0x92   :  { %273 = vmatmul.mubr.f32.gmra.mrb[10].mxu1 %v110_v8  ;;  %3168 = vmatprep.subr.bf16.mxu0 %v4061_v6 }
  0x93   :  { %3082 = vmatpush3.bf16.msra.mxu1 %v3079_v4  ;;  %278 = vmatprep.mubr.f32.mxu1 %v4651_v0 }
  0x94   :  { %3084 = vmatprep.subr.bf16.mxu1 %v3083_v10 }
  0x95   :  { %3170 = vmatpush1.bf16.msra.mxu0 %v4064_v15 }
  0x96   :  { %279 = vmatmul.mubr.f32.gmra.mrb[12].mxu1 %v111_v14  ;;  %3172 = vmatprep.subr.bf16.mxu0 %v4067_v20 }
  0x97   :  { %3086 = vmatpush3.bf16.msra.mxu1 %v3083_v10  ;;  %284 = vmatprep.mubr.f32.mxu1 %v4651_v0 }
  0x98   :  { %3088 = vmatprep.subr.bf16.mxu1 %v3087_v16 }
  0x99   :  { %3174 = vmatpush1.bf16.msra.mxu0 %v4070_v29 }
  0x9a   :  { %285 = vmatmul.mubr.f32.gmra.mrb[14].mxu1 %v112_v17  ;;  %3176 = vmatprep.subr.bf16.mxu0 %v4073_v34 }
  0x9b   :  { %3090 = vmatpush3.bf16.msra.mxu1 %v3087_v16  ;;  %2691 = vmatprep.mubr.f32.mxu1 %v4079_v46  ;;  %v475_v46 = vld [vmem:[#allocation11 + $0x148] sm:$0xff] }
  0x9c   :  { %3123 = vmatprep.subr.bf16.mxu1 %v3904_v23  ;;  %v4146_v48 = vpack.c.bf16 %v475_v46, %v472_v45 }
  0x9d   :  { %3178 = vmatpush1.bf16.msra.mxu0 %v4076_v41 }
  0x9e   :  { %2692 = vmatmul.mubr.f32.vlgmr.msra.gmra.mrb[16].mxu1 %v4087_v51  ;;  %3204 = vmatprep.subr.bf16.mxu0 %v4032_v9  ;;  %v457_v9 = vld [vmem:[#allocation11 + $0xb8] sm:$0xff]  ;;  %v4150_v51 = vpack.c.bf16 %v481_v50, %v478_v49 }
  0x9f   :  { %3125 = vmatpush3.bf16.msra.mxu1 %v4116_v21  ;;  %2694 = vmatprep.mubr.f32.mxu1 %v4095_v56  ;;  %v4132_v33 = vpack.c.bf16 %v457_v9, %v454_v32  ;;  %v161_v56 = vld [vmem:[%s4645_s4] sm:$0x7] }
  0xa0   :  { %3126 = vmatprep.subr.bf16.mxu1 %v3904_v23  ;;  %v166_v59 = vrot.slane %v161_v56, %v165_v55  ;;  %v170_v60 = vrot.slane %v161_v56, %v169_v58 }
  0xa2   :  { %2695 = vmatmul.mubr.f32.gmra.mrb[18].mxu1 %v108_v61 }
  0xa3   :  { %3128 = vmatpush3.bf16.msra.mxu1 %v4123_v27  ;;  %2697 = vmatprep.mubr.f32.mxu1 %v109_v3 }
  0xa4   :  { %3129 = vmatprep.subr.bf16.mxu1 %v3904_v23 }
  0xa6   :  { %2698 = vmatmul.mubr.f32.gmra.mrb[20].mxu1 %v110_v8 }
  0xa7   :  { %3131 = vmatpush3.bf16.msra.mxu1 %v4128_v31  ;;  %2700 = vmatprep.mubr.f32.mxu1 %v111_v14 }
  0xa8   :  { %3132 = vmatprep.subr.bf16.mxu1 %v3904_v23 }
  0xaa   :  { %2701 = vmatmul.mubr.f32.gmra.mrb[22].mxu1 %v112_v17 }
  0xab   :  { %3134 = vmatpush3.bf16.msra.mxu1 %v4132_v33  ;;  %2735 = vmatprep.mubr.msk.f32.mxu1 %vm3905_vm0, %v4651_v0 }
  0xac   :  { %3135 = vmatprep.subr.bf16.mxu1 %v3904_v23 }
  0xaf   :  { %3137 = vmatpush3.bf16.msra.mxu1 %v4136_v38 }
  0xb0   :  { %3138 = vmatprep.subr.bf16.mxu1 %v3904_v23 }
  0xb3   :  { %3140 = vmatpush3.bf16.msra.mxu1 %v4142_v43 }
  0xb4   :  { %3141 = vmatprep.subr.bf16.mxu1 %v3904_v23 }
  0xb7   :  { %3143 = vmatpush3.bf16.msra.mxu1 %v4146_v48 }
  0xb8   :  { %3144 = vmatprep.subr.bf16.mxu1 %v3904_v23 }
  0xbb   :  { %3146 = vmatpush3.bf16.msra.mxu1 %v4150_v51 }
  0xbc   :  { %3179 = vmatprep.subr.bf16.mxu1 %v3904_v23 }
  0xbe   :  { %2736 = vmatmul.mubr.f32.vlgmr.msra.gmra.mrb[24].mxu1 %v4082_v47 }
  0xbf   :  { %3181 = vmatpush3.bf16.msra.mxu1 %v4116_v21  ;;  %2770 = vmatprep.mubr.msk.f32.mxu1 %vm3905_vm0, %v4651_v0 }
  0xc0   :  { %3182 = vmatprep.subr.bf16.mxu1 %v3904_v23 }
  0xc3   :  { %3184 = vmatpush3.bf16.msra.mxu1 %v4123_v27 }
  0xc4   :  { %3185 = vmatprep.subr.bf16.mxu1 %v3904_v23 }
  0xc7   :  { %3187 = vmatpush3.bf16.msra.mxu1 %v4128_v31 }
  0xc8   :  { %3188 = vmatprep.subr.bf16.mxu1 %v3904_v23 }
  0xcb   :  { %3190 = vmatpush3.bf16.msra.mxu1 %v4132_v33 }
  0xcc   :  { %3191 = vmatprep.subr.bf16.mxu1 %v3904_v23 }
  0xcf   :  { %3193 = vmatpush3.bf16.msra.mxu1 %v4136_v38 }
  0xd0   :  { %3194 = vmatprep.subr.bf16.mxu1 %v3904_v23 }
  0xd3   :  { %3196 = vmatpush3.bf16.msra.mxu1 %v4142_v43 }
  0xd4   :  { %3197 = vmatprep.subr.bf16.mxu1 %v3904_v23 }
  0xd7   :  { %3199 = vmatpush3.bf16.msra.mxu1 %v4146_v48 }
  0xd8   :  { %3200 = vmatprep.subr.bf16.mxu1 %v3904_v23 }
  0xdb   :  { %3202 = vmatpush3.bf16.msra.mxu1 %v4150_v51 }
  0xdc   :  { %3235 = vmatprep.subr.bf16.mxu1 %v3904_v23 }
 0x151   :  { %v244_v61 = vpop.f32.mrb[0].mxu1 }
 0x152   :  { %v245_v62 = vadd.f32 %v244_v61, %v166_v59  ;;  %v246_v63 = vpop.f32.mrb[1].mxu1 }
 0x153   :  { %v548_v2 = vpop.f32.mrb[0].mxu0  ;;  %v247_v3 = vadd.f32 %v246_v63, %v170_v60  ;;  %v174_v63 = vrot.slane %v161_v56, %v173_v53 }
 0x154   :  { %v550_v4 = vpop.f32.mrb[1].mxu0  ;;  %v623_v5 = vadd.f32 %v548_v2, %v245_v62 }
 0x155   :  { %v630_v7 = vadd.f32 %v550_v4, %v247_v3  ;;  %v250_v8 = vpop.f32.mrb[2].mxu1 }
 0x156   :  { %v4177_v10 = vadd.f32 %v250_v8, %v166_v59  ;;  %v252_v11 = vpop.f32.mrb[3].mxu1 }
 0x157   :  { %v4179_v12 = vadd.f32 %v252_v11, %v170_v60  ;;  %v2458_v11 = vmul.f32 -1.442695, %v623_v5 }
 0x159   :  { %v256_v14 = vpop.f32.mrb[4].mxu1  ;;  %3617 = vpow2.f32 %v2458_v11 }
 0x15a   :  { %v4181_v16 = vadd.f32 %v256_v14, %v166_v59  ;;  %v258_v17 = vpop.f32.mrb[5].mxu1 }
 0x15b   :  { %v4183_v18 = vadd.f32 %v258_v17, %v170_v60 }
 0x15d   :  { %v262_v19 = vpop.f32.mrb[6].mxu1 }
 0x15e   :  { %v4185_v24 = vadd.f32 %v262_v19, %v166_v59  ;;  %v264_v25 = vpop.f32.mrb[7].mxu1 }
 0x15f   :  { %v4187_v28 = vadd.f32 %v264_v25, %v170_v60 }
 0x161   :  { %v268_v30 = vpop.f32.mrb[8].mxu1 }
 0x162   :  { %v4189_v32 = vadd.f32 %v268_v30, %v166_v59  ;;  %v270_v9 = vpop.f32.mrb[9].mxu1 }
 0x163   :  { %v4191_v36 = vadd.f32 %v270_v9, %v170_v60  ;;  %v3618_v5 = vpop.eup %3617 }
 0x165   :  { %v274_v37 = vpop.f32.mrb[10].mxu1 }
 0x166   :  { %v4193_v40 = vadd.f32 %v274_v37, %v166_v59  ;;  %v276_v42 = vpop.f32.mrb[11].mxu1 }
 0x167   :  { %v4195_v45 = vadd.f32 %v276_v42, %v170_v60  ;;  %v2459_v42 = vmul.f32 -1.442695, %v630_v7 }
 0x169   :  { %v280_v46 = vpop.f32.mrb[12].mxu1  ;;  %3619 = vpow2.f32 %v2459_v42 }
 0x16a   :  { %v4197_v49 = vadd.f32 %v280_v46, %v166_v59  ;;  %v282_v50 = vpop.f32.mrb[13].mxu1 }
 0x16b   :  { %v4199_v55 = vadd.f32 %v282_v50, %v170_v60  ;;  %v627_v50 = vadd.f32 1.0, %v3618_v5 }
 0x16d   :  { %v286_v58 = vpop.f32.mrb[14].mxu1  ;;  %3621 = vrcp.f32 %v627_v50 }
 0x16e   :  { %v4201_v61 = vadd.f32 %v286_v58, %v166_v59  ;;  %v288_v62 = vpop.f32.mrb[15].mxu1  ;;  %v4222_v58 = vld [vmem:[%s4646_s5] ss:$0 sm:$0xff] }
 0x16f   :  { %v4203_v2 = vadd.f32 %v288_v62, %v170_v60 }
 0x171   :  { %v2693_v3 = vpop.f32.mrb[16].mxu1 }
 0x172   :  { %v4205_v4 = vadd.f32 %v2693_v3, %v174_v63  ;;  %v357_v8 = vpop.f32.mrb[17].mxu1 }
 0x173   :  { %v3620_v53 = vpop.eup %3619  ;;  %v358_v7 = vadd.f32 %v357_v8, %v174_v63 }
 0x174   :  { %v634_v62 = vadd.f32 1.0, %v3620_v53 }
 0x175   :  { %v2696_v14 = vpop.f32.mrb[18].mxu1 }
 0x176   :  { %v4207_v17 = vadd.f32 %v2696_v14, %v174_v63  ;;  %v367_v19 = vpop.f32.mrb[19].mxu1  ;;  %3623 = vrcp.f32 %v634_v62 }
 0x177   :  { %v4209_v25 = vadd.f32 %v367_v19, %v174_v63  ;;  %v3622_v19 = vpop.eup %3621 }
 0x179   :  { %v2699_v54 = vpop.f32.mrb[20].mxu1 }
 0x17a   :  { %v4211_v30 = vadd.f32 %v2699_v54, %v174_v63  ;;  %v377_v59 = vpop.f32.mrb[21].mxu1 }
 0x17b   :  { %v4213_v9 = vadd.f32 %v377_v59, %v174_v63 }
 0x17d   :  { %v2702_v56 = vpop.f32.mrb[22].mxu1 }
 0x17e   :  { %v4215_v60 = vadd.f32 %v2702_v56, %v174_v63  ;;  %v387_v37 = vpop.f32.mrb[23].mxu1 }
 0x17f   :  { %v4217_v46 = vadd.f32 %v387_v37, %v174_v63  ;;  %v4653_v63 = vmov 0.0  }
 0x180   :  { %v3624_v56 = vpop.eup %3623 }
 0x181   :  { %v641_v37 = vsub.f32 1.0, %v3624_v56  ;;  %v643_v50 = vmul.f32 %v3624_v56, %v4082_v47  ;;  %v1102_v56 = vld [vmem:[#allocation11 + $0x60] sm:$0xff] }
 0x191   :  { %v619_v3 = vpop.f32.mrb[24].mxu1 }
 0x192   :  { %v637_v11 = vadd.f32 %v4222_v58, %v619_v3  ;;  %v2737_v14 = vpop.f32.mrb[25].mxu1 }
 0x193   :  { %v1096_v14 = vld [vmem:[#allocation11 + $0x30] sm:$0xff] }
 0x194   :  { %v638_v54 = vmul.f32 %v3622_v19, %v637_v11 }
 0x196   :  { %v639_v59 = vadd.f32 %v638_v54, %v358_v7  ;;  %v1103_v7 = vld [vmem:[#allocation11 + $0x68] sm:$0xff]  ;;  %v1106_v54 = vld [vmem:[#allocation11 + $0x80] sm:$0xff] }
 0x198   :  { %3625 = vtanh.f32 %v639_v59  ;;  %v4305_v59 = vpack.c.bf16 %v1106_v54, %v1103_v7 }
 0x1a2   :  { %v3626_v42 = vpop.eup %3625 }
 0x1a3   :  { %v642_v5 = vmul.f32 %v3626_v42, %v641_v37  ;;  %v1105_v37 = vld [vmem:[#allocation11 + $0x78] sm:$0xff] }
 0x1a4   :  { %v4307_v42 = vpack.c.bf16 %v1105_v37, %v1102_v56 }
 0x1a5   :  { %v4226_v0 = vadd.f32 %v643_v50, %v642_v5  ;;  %v1109_v5 = vld [vmem:[#allocation11 + $0x98] sm:$0xff]  ;;  %v1112_v50 = vld [vmem:[#allocation11 + $0xb0] sm:$0xff] }
 0x1a7   :  { %765 = vmatmul.mubr.f32.vlgmr.msra.gmra.mrb[2].mxu0 %v4226_v0  ;;  %2184 = vst [vmem:[#allocation15] sm:$0xff] %v4226_v0  ;;  %2771 = vmatmul.mubr.f32.vlgmr.msra.gmra.mrb[26].mxu1 %v4226_v0 }
 0x1a8   :  { %3206 = vmatpush1.bf16.msra.mxu0 %v4034_v13  ;;  %3237 = vmatpush3.bf16.msra.mxu1 %v4116_v21 }
 0x1a9   :  { %3208 = vmatprep.subr.bf16.mxu0 %v4038_v22  ;;  %3238 = vmatprep.subr.bf16.mxu1 %v3904_v23 }
 0x1aa   :  { %983 = vmatprep.mubr.f32.mxu0 %v4653_v63  ;;  %2805 = vmatprep.mubr.msk.f32.mxu1 %vm3905_vm0, %v4653_v63 }
 0x1ac   :  { %3210 = vmatpush1.bf16.msra.mxu0 %v4040_v26  ;;  %3240 = vmatpush3.bf16.msra.mxu1 %v4123_v27 }
 0x1ad   :  { %3212 = vmatprep.subr.bf16.mxu0 %v4043_v35  ;;  %3241 = vmatprep.subr.bf16.mxu1 %v3904_v23 }
 0x1b0   :  { %3214 = vmatpush1.bf16.msra.mxu0 %v4046_v39  ;;  %3243 = vmatpush3.bf16.msra.mxu1 %v4128_v31 }
 0x1b1   :  { %3216 = vmatprep.subr.bf16.mxu0 %v4049_v44  ;;  %3244 = vmatprep.subr.bf16.mxu1 %v3904_v23 }
 0x1b4   :  { %3218 = vmatpush1.bf16.msra.mxu0 %v4052_v52  ;;  %3246 = vmatpush3.bf16.msra.mxu1 %v4132_v33 }
 0x1b5   :  { %3220 = vmatprep.subr.bf16.mxu0 %v4055_v57  ;;  %3247 = vmatprep.subr.bf16.mxu1 %v3904_v23 }
 0x1b8   :  { %3222 = vmatpush1.bf16.msra.mxu0 %v4058_v1  ;;  %3249 = vmatpush3.bf16.msra.mxu1 %v4136_v38 }
 0x1b9   :  { %3224 = vmatprep.subr.bf16.mxu0 %v4061_v6  ;;  %3250 = vmatprep.subr.bf16.mxu1 %v3904_v23 }
 0x1bc   :  { %3226 = vmatpush1.bf16.msra.mxu0 %v4064_v15  ;;  %3252 = vmatpush3.bf16.msra.mxu1 %v4142_v43 }
 0x1bd   :  { %3228 = vmatprep.subr.bf16.mxu0 %v4067_v20  ;;  %3253 = vmatprep.subr.bf16.mxu1 %v3904_v23 }
 0x1c0   :  { %3230 = vmatpush1.bf16.msra.mxu0 %v4070_v29  ;;  %3255 = vmatpush3.bf16.msra.mxu1 %v4146_v48 }
 0x1c1   :  { %3232 = vmatprep.subr.bf16.mxu0 %v4073_v34  ;;  %3256 = vmatprep.subr.bf16.mxu1 %v3904_v23 }
 0x1c4   :  { %3234 = vmatpush1.bf16.msra.mxu0 %v4076_v41  ;;  %3258 = vmatpush3.bf16.msra.mxu1 %v4150_v51 }
 0x1c5   :  { %3291 = vmatprep.subr.bf16.mxu1 %v3904_v23 }
 0x27a   :  { %v766_v13 = vpop.f32.mrb[2].mxu0  ;;  %v837_v22 = vpop.f32.mrb[26].mxu1 }
 0x27b   :  { %v841_v26 = vadd.f32 %v766_v13, %v4177_v10  ;;  %v768_v35 = vpop.f32.mrb[3].mxu0  ;;  %v2772_v39 = vpop.f32.mrb[27].mxu1  ;;  %v855_v29 = vadd.f32 %v4222_v58, %v837_v22  ;;  %v4311_v13 = vpack.c.bf16 %v1112_v50, %v1109_v5  ;;  %v1108_v22 = vld [vmem:[#allocation11 + $0x90] sm:$0xff] }
 0x27c   :  { %v848_v44 = vadd.f32 %v768_v35, %v4179_v12  ;;  %v1115_v39 = vld [vmem:[#allocation11 + $0xc8] sm:$0xff] }
 0x27d   :  { %v2460_v52 = vmul.f32 -1.442695, %v841_v26  ;;  %v1111_v26 = vld [vmem:[#allocation11 + $0xa8] sm:$0xff] }
 0x27e   :  { %v2461_v57 = vmul.f32 -1.442695, %v848_v44  ;;  %v4313_v35 = vpack.c.bf16 %v1111_v26, %v1108_v22  ;;  %v1118_v44 = vld [vmem:[#allocation11 + $0xe0] sm:$0xff] }
 0x27f   :  { %3627 = vpow2.f32 %v2460_v52  ;;  %v4317_v52 = vpack.c.bf16 %v1118_v44, %v1115_v39 }
 0x280   :  { %3629 = vpow2.f32 %v2461_v57  ;;  %v1114_v57 = vld [vmem:[#allocation11 + $0xc0] sm:$0xff] }
 0x289   :  { %v3628_v1 = vpop.eup %3627 }
 0x28a   :  { %v845_v6 = vadd.f32 1.0, %v3628_v1  ;;  %v3630_v15 = vpop.eup %3629  ;;  %v1117_v1 = vld [vmem:[#allocation11 + $0xd8] sm:$0xff] }
 0x28b   :  { %v852_v20 = vadd.f32 1.0, %v3630_v15  ;;  %v1121_v15 = vld [vmem:[#allocation11 + $0xf8] sm:$0xff] }
 0x28c   :  { %3631 = vrcp.f32 %v845_v6  ;;  %v4319_v6 = vpack.c.bf16 %v1117_v1, %v1114_v57 }
 0x28d   :  { %3633 = vrcp.f32 %v852_v20  ;;  %v1124_v20 = vld [vmem:[#allocation11 + $0x110] sm:$0xff] }
 0x296   :  { %v3632_v34 = vpop.eup %3631 }
 0x297   :  { %v856_v41 = vmul.f32 %v3632_v34, %v855_v29  ;;  %v3634_v10 = vpop.eup %3633  ;;  %v1120_v29 = vld [vmem:[#allocation11 + $0xf0] sm:$0xff]  ;;  %v4323_v34 = vpack.c.bf16 %v1124_v20, %v1121_v15 }
 0x298   :  { %v859_v8 = vsub.f32 1.0, %v3634_v10  ;;  %v861_v62 = vmul.f32 %v3634_v10, %v4226_v0  ;;  %v1130_v10 = vld [vmem:[#allocation11 + $0x140] sm:$0xff] }
 0x299   :  { %v857_v47 = vadd.f32 %v856_v41, %v4205_v4  ;;  %v1123_v41 = vld [vmem:[#allocation11 + $0x108] sm:$0xff] }
 0x29b   :  { %3635 = vtanh.f32 %v857_v47  ;;  %v1127_v47 = vld [vmem:[#allocation11 + $0x128] sm:$0xff] }
 0x2a5   :  { %v3636_v12 = vpop.eup %3635 }
 0x2a6   :  { %v860_v53 = vmul.f32 %v3636_v12, %v859_v8  ;;  %v4325_v8 = vpack.c.bf16 %v1123_v41, %v1120_v29  ;;  %v4327_v12 = vpack.c.bf16 %v1130_v10, %v1127_v47 }
 0x2a8   :  { %v4270_v3 = vadd.f32 %v861_v62, %v860_v53  ;;  %v1126_v53 = vld [vmem:[#allocation11 + $0x120] sm:$0xff]  ;;  %v1129_v62 = vld [vmem:[#allocation11 + $0x138] sm:$0xff] }
 0x2aa   :  { %984 = vmatmul.mubr.f32.vlgmr.msra.gmra.mrb[4].mxu0 %v4270_v3  ;;  %2806 = vmatmul.mubr.f32.vlgmr.msra.gmra.mrb[28].mxu1 %v4270_v3 }
 0x2ab   :  { %3293 = vmatpush3.bf16.msra.mxu1 %v4116_v21  ;;  %1202 = vmatprep.mubr.f32.mxu0 %v4653_v63  ;;  %v1091_v21 = vld [vmem:[#allocation11 + $0x8] sm:$0xff] }
 0x2ac   :  { %3294 = vmatprep.subr.bf16.mxu1 %v3904_v23  ;;  %2840 = vmatprep.mubr.msk.f32.mxu1 %vm3905_vm0, %v4653_v63 }
 0x2af   :  { %3296 = vmatpush3.bf16.msra.mxu1 %v4123_v27  ;;  %v1094_v27 = vld [vmem:[#allocation11 + $0x20] sm:$0xff] }
 0x2b0   :  { %3297 = vmatprep.subr.bf16.mxu1 %v3904_v23 }
 0x2b3   :  { %3299 = vmatpush3.bf16.msra.mxu1 %v4128_v31  ;;  %v4293_v31 = vpack.c.bf16 %v1094_v27, %v1091_v21  ;;  %v1133_v21 = vld [vmem:[#allocation11 + $0x158] sm:$0xff]  ;;  %v1136_v27 = vld [vmem:[#allocation11 + $0x170] sm:$0xff] }
 0x2b4   :  { %3300 = vmatprep.subr.bf16.mxu1 %v3904_v23 }
 0x2b5   :  { %3260 = vmatprep.subr.bf16.mxu0 %v4293_v31 }
 0x2b7   :  { %3302 = vmatpush3.bf16.msra.mxu1 %v4132_v33  ;;  %v1090_v33 = vld [vmem:[#allocation11] sm:$0xff] }
 0x2b8   :  { %3303 = vmatprep.subr.bf16.mxu1 %v3904_v23 }
 0x2bb   :  { %3305 = vmatpush3.bf16.msra.mxu1 %v4136_v38  ;;  %v1093_v38 = vld [vmem:[#allocation11 + $0x18] sm:$0xff] }
 0x2bc   :  { %3306 = vmatprep.subr.bf16.mxu1 %v3904_v23  ;;  %v4295_v4 = vpack.c.bf16 %v1093_v38, %v1090_v33  ;;  %v4331_v33 = vpack.c.bf16 %v1129_v62, %v1126_v53  ;;  %v4334_v38 = vpack.c.bf16 %v1136_v27, %v1133_v21  ;;  %v1314_v62 = vld [vmem:[#allocation11 + $0x28] sm:$0xff]  ;;  %v1317_v27 = vld [vmem:[#allocation11 + $0x40] sm:$0xff] }
 0x2be   :  { %3262 = vmatpush1.bf16.msra.mxu0 %v4295_v4 }
 0x2bf   :  { %3308 = vmatpush3.bf16.msra.mxu1 %v4142_v43  ;;  %v1097_v43 = vld [vmem:[#allocation11 + $0x38] sm:$0xff] }
 0x2c0   :  { %3309 = vmatprep.subr.bf16.mxu1 %v3904_v23 }
 0x2c3   :  { %3311 = vmatpush3.bf16.msra.mxu1 %v4146_v48  ;;  %v1100_v48 = vld [vmem:[#allocation11 + $0x50] sm:$0xff] }
 0x2c4   :  { %3312 = vmatprep.subr.bf16.mxu1 %v3904_v23  ;;  %v4299_v11 = vpack.c.bf16 %v1100_v48, %v1097_v43  ;;  %v1132_v43 = vld [vmem:[#allocation11 + $0x150] sm:$0xff]  ;;  %v1135_v48 = vld [vmem:[#allocation11 + $0x168] sm:$0xff] }
 0x2c6   :  { %3264 = vmatprep.subr.bf16.mxu0 %v4299_v11 }
 0x2c7   :  { %3314 = vmatpush3.bf16.msra.mxu1 %v4150_v51  ;;  %v1099_v51 = vld [vmem:[#allocation11 + $0x48] sm:$0xff] }
 0x2c8   :  { %3347 = vmatprep.subr.bf16.mxu1 %v3904_v23  ;;  %v4301_v19 = vpack.c.bf16 %v1099_v51, %v1096_v14  ;;  %v4337_v14 = vpack.c.bf16 %v1135_v48, %v1132_v43  ;;  %v1320_v43 = vld [vmem:[#allocation11 + $0x58] sm:$0xff] }
 0x2c9   :  { %v4374_v48 = vpack.c.bf16 %v1320_v43, %v1317_v27 }
 0x2ca   :  { %3266 = vmatpush1.bf16.msra.mxu0 %v4301_v19 }
 0x2cb   :  { %3268 = vmatprep.subr.bf16.mxu0 %v4305_v59 }
 0x2ce   :  { %3270 = vmatpush1.bf16.msra.mxu0 %v4307_v42 }
 0x2cf   :  { %3272 = vmatprep.subr.bf16.mxu0 %v4311_v13 }
 0x2d2   :  { %3274 = vmatpush1.bf16.msra.mxu0 %v4313_v35 }
 0x2d3   :  { %3276 = vmatprep.subr.bf16.mxu0 %v4317_v52 }
 0x2d6   :  { %3278 = vmatpush1.bf16.msra.mxu0 %v4319_v6 }
 0x2d7   :  { %3280 = vmatprep.subr.bf16.mxu0 %v4323_v34 }
 0x2da   :  { %3282 = vmatpush1.bf16.msra.mxu0 %v4325_v8 }
 0x2db   :  { %3284 = vmatprep.subr.bf16.mxu0 %v4327_v12 }
 0x2de   :  { %3286 = vmatpush1.bf16.msra.mxu0 %v4331_v33 }
 0x2df   :  { %3288 = vmatprep.subr.bf16.mxu0 %v4334_v38 }
 0x2e2   :  { %3290 = vmatpush1.bf16.msra.mxu0 %v4337_v14 }
 0x2e3   :  { %3316 = vmatprep.subr.bf16.mxu0 %v4293_v31 }
 0x37d   :  { %v985_v51 = vpop.f32.mrb[4].mxu0  ;;  %v1056_v7 = vpop.f32.mrb[28].mxu1 }
 0x37e   :  { %v1060_v54 = vadd.f32 %v985_v51, %v4181_v16  ;;  %v987_v56 = vpop.f32.mrb[5].mxu0  ;;  %v2807_v37 = vpop.f32.mrb[29].mxu1  ;;  %v1074_v1 = vadd.f32 %v4222_v58, %v1056_v7  ;;  %v1323_v51 = vld [vmem:[#allocation11 + $0x70] sm:$0xff]  ;;  %v1326_v7 = vld [vmem:[#allocation11 + $0x88] sm:$0xff] }
 0x37f   :  { %v1067_v5 = vadd.f32 %v987_v56, %v4183_v18  ;;  %v1329_v56 = vld [vmem:[#allocation11 + $0xa0] sm:$0xff]  ;;  %v1332_v37 = vld [vmem:[#allocation11 + $0xb8] sm:$0xff] }
 0x380   :  { %v2462_v50 = vmul.f32 -1.442695, %v1060_v54  ;;  %v4378_v54 = vpack.c.bf16 %v1326_v7, %v1323_v51 }
 0x381   :  { %v2463_v22 = vmul.f32 -1.442695, %v1067_v5  ;;  %v4382_v5 = vpack.c.bf16 %v1332_v37, %v1329_v56 }
 0x382   :  { %3637 = vpow2.f32 %v2462_v50  ;;  %v1335_v50 = vld [vmem:[#allocation11 + $0xd0] sm:$0xff] }
 0x383   :  { %3639 = vpow2.f32 %v2463_v22  ;;  %v1338_v22 = vld [vmem:[#allocation11 + $0xe8] sm:$0xff] }
 0x38c   :  { %v3638_v26 = vpop.eup %3637 }
 0x38d   :  { %v1064_v39 = vadd.f32 1.0, %v3638_v26  ;;  %v3640_v44 = vpop.eup %3639  ;;  %v4386_v26 = vpack.c.bf16 %v1338_v22, %v1335_v50 }
 0x38e   :  { %v1071_v57 = vadd.f32 1.0, %v3640_v44  ;;  %v1344_v44 = vld [vmem:[#allocation11 + $0x118] sm:$0xff] }
 0x38f   :  { %3641 = vrcp.f32 %v1064_v39  ;;  %v1341_v39 = vld [vmem:[#allocation11 + $0x100] sm:$0xff] }
 0x390   :  { %3643 = vrcp.f32 %v1071_v57  ;;  %v4390_v57 = vpack.c.bf16 %v1344_v44, %v1341_v39 }
 0x399   :  { %v3642_v15 = vpop.eup %3641 }
 0x39a   :  { %v1075_v20 = vmul.f32 %v3642_v15, %v1074_v1  ;;  %v3644_v29 = vpop.eup %3643  ;;  %v1347_v1 = vld [vmem:[#allocation11 + $0x130] sm:$0xff]  ;;  %v1350_v15 = vld [vmem:[#allocation11 + $0x148] sm:$0xff] }
 0x39b   :  { %v1078_v41 = vsub.f32 1.0, %v3644_v29  ;;  %v1080_v10 = vmul.f32 %v3644_v29, %v4270_v3  ;;  %v1356_v29 = vld [vmem:[#allocation11 + $0x178] sm:$0xff] }
 0x39c   :  { %v1076_v16 = vadd.f32 %v1075_v20, %v4209_v25  ;;  %v1311_v25 = vld [vmem:[#allocation11 + $0x10] sm:$0xff]  ;;  %v4393_v20 = vpack.c.bf16 %v1350_v15, %v1347_v1 }
 0x39d   :  { %v4370_v21 = vpack.c.bf16 %v1314_v62, %v1311_v25 }
 0x39e   :  { %3645 = vtanh.f32 %v1076_v16  ;;  %v1353_v16 = vld [vmem:[#allocation11 + $0x160] sm:$0xff] }
 0x3a8   :  { %v3646_v18 = vpop.eup %3645 }
 0x3a9   :  { %v1079_v47 = vmul.f32 %v3646_v18, %v1078_v41  ;;  %v4397_v41 = vpack.c.bf16 %v1356_v29, %v1353_v16 }
 0x3ab   :  { %v4347_v53 = vadd.f32 %v1080_v10, %v1079_v47 }
 0x3ad   :  { %1203 = vmatmul.mubr.f32.vlgmr.msra.gmra.mrb[6].mxu0 %v4347_v53  ;;  %2841 = vmatmul.mubr.f32.vlgmr.msra.gmra.mrb[30].mxu1 %v4347_v53 }
 0x3ae   :  { %3318 = vmatpush1.bf16.msra.mxu0 %v4295_v4  ;;  %1421 = vmatprep.mubr.f32.mxu0 %v4653_v63 }
 0x3af   :  { %3320 = vmatprep.subr.bf16.mxu0 %v4299_v11  ;;  %2875 = vmatprep.mubr.msk.f32.mxu1 %vm3905_vm0, %v4653_v63 }
 0x3b0   :  { %3349 = vmatpush3.bf16.msra.mxu1 %v4370_v21 }
 0x3b1   :  { %3350 = vmatprep.subr.bf16.mxu1 %v3904_v23 }
 0x3b2   :  { %3322 = vmatpush1.bf16.msra.mxu0 %v4301_v19 }
 0x3b3   :  { %3324 = vmatprep.subr.bf16.mxu0 %v4305_v59 }
 0x3b4   :  { %3352 = vmatpush3.bf16.msra.mxu1 %v4374_v48 }
 0x3b5   :  { %3353 = vmatprep.subr.bf16.mxu1 %v3904_v23 }
 0x3b6   :  { %3326 = vmatpush1.bf16.msra.mxu0 %v4307_v42 }
 0x3b7   :  { %3328 = vmatprep.subr.bf16.mxu0 %v4311_v13 }
 0x3b8   :  { %3355 = vmatpush3.bf16.msra.mxu1 %v4378_v54 }
 0x3b9   :  { %3356 = vmatprep.subr.bf16.mxu1 %v3904_v23 }
 0x3ba   :  { %3330 = vmatpush1.bf16.msra.mxu0 %v4313_v35 }
 0x3bb   :  { %3332 = vmatprep.subr.bf16.mxu0 %v4317_v52 }
 0x3bc   :  { %3358 = vmatpush3.bf16.msra.mxu1 %v4382_v5 }
 0x3bd   :  { %3359 = vmatprep.subr.bf16.mxu1 %v3904_v23 }
 0x3be   :  { %3334 = vmatpush1.bf16.msra.mxu0 %v4319_v6 }
 0x3bf   :  { %3336 = vmatprep.subr.bf16.mxu0 %v4323_v34 }
 0x3c0   :  { %3361 = vmatpush3.bf16.msra.mxu1 %v4386_v26 }
 0x3c1   :  { %3362 = vmatprep.subr.bf16.mxu1 %v3904_v23 }
 0x3c2   :  { %3338 = vmatpush1.bf16.msra.mxu0 %v4325_v8 }
 0x3c3   :  { %3340 = vmatprep.subr.bf16.mxu0 %v4327_v12 }
 0x3c4   :  { %3364 = vmatpush3.bf16.msra.mxu1 %v4390_v57 }
 0x3c5   :  { %3365 = vmatprep.subr.bf16.mxu1 %v3904_v23 }
 0x3c6   :  { %3342 = vmatpush1.bf16.msra.mxu0 %v4331_v33 }
 0x3c7   :  { %3344 = vmatprep.subr.bf16.mxu0 %v4334_v38 }
 0x3c8   :  { %3367 = vmatpush3.bf16.msra.mxu1 %v4393_v20 }
 0x3c9   :  { %3368 = vmatprep.subr.bf16.mxu1 %v3904_v23 }
 0x3ca   :  { %3346 = vmatpush1.bf16.msra.mxu0 %v4337_v14 }
 0x3cb   :  { %3372 = vmatprep.subr.bf16.mxu0 %v4293_v31 }
 0x3cc   :  { %3370 = vmatpush3.bf16.msra.mxu1 %v4397_v41 }
 0x3cd   :  { %3403 = vmatprep.subr.bf16.mxu1 %v3904_v23 }
 0x480   :  { %v1204_v18 = vpop.f32.mrb[6].mxu0  ;;  %v1275_v47 = vpop.f32.mrb[30].mxu1 }
 0x481   :  { %v1279_v10 = vadd.f32 %v1204_v18, %v4185_v24  ;;  %v1206_v25 = vpop.f32.mrb[7].mxu0  ;;  %v2842_v62 = vpop.f32.mrb[31].mxu1  ;;  %v1293_v22 = vadd.f32 %v4222_v58, %v1275_v47 }
 0x482   :  { %v1286_v27 = vadd.f32 %v1206_v25, %v4187_v28 }
 0x483   :  { %v2464_v43 = vmul.f32 -1.442695, %v1279_v10 }
 0x484   :  { %v2465_v51 = vmul.f32 -1.442695, %v1286_v27 }
 0x485   :  { %3647 = vpow2.f32 %v2464_v43 }
 0x486   :  { %3649 = vpow2.f32 %v2465_v51 }
 0x48f   :  { %v3648_v7 = vpop.eup %3647 }
 0x490   :  { %v1283_v56 = vadd.f32 1.0, %v3648_v7  ;;  %v3650_v37 = vpop.eup %3649 }
 0x491   :  { %v1290_v50 = vadd.f32 1.0, %v3650_v37 }
 0x492   :  { %3651 = vrcp.f32 %v1283_v56 }
 0x493   :  { %3653 = vrcp.f32 %v1290_v50 }
 0x49c   :  { %v3652_v39 = vpop.eup %3651 }
 0x49d   :  { %v1294_v44 = vmul.f32 %v3652_v39, %v1293_v22  ;;  %v3654_v1 = vpop.eup %3653 }
 0x49e   :  { %v1297_v15 = vsub.f32 1.0, %v3654_v1  ;;  %v1299_v29 = vmul.f32 %v3654_v1, %v4347_v53 }
 0x49f   :  { %v1295_v24 = vadd.f32 %v1294_v44, %v4207_v17 }
 0x4a1   :  { %3655 = vtanh.f32 %v1295_v24 }
 0x4ab   :  { %v3656_v28 = vpop.eup %3655 }
 0x4ac   :  { %v1298_v16 = vmul.f32 %v3656_v28, %v1297_v15 }
 0x4ae   :  { %v4407_v18 = vadd.f32 %v1299_v29, %v1298_v16 }
 0x4b0   :  { %1422 = vmatmul.mubr.f32.vlgmr.msra.gmra.mrb[8].mxu0 %v4407_v18  ;;  %2876 = vmatmul.mubr.f32.vlgmr.msra.gmra.mrb[32].mxu1 %v4407_v18 }
 0x4b1   :  { %3374 = vmatpush1.bf16.msra.mxu0 %v4295_v4  ;;  %3405 = vmatpush3.bf16.msra.mxu1 %v4370_v21 }
 0x4b2   :  { %3376 = vmatprep.subr.bf16.mxu0 %v4299_v11  ;;  %3406 = vmatprep.subr.bf16.mxu1 %v3904_v23 }
 0x4b3   :  { %1640 = vmatprep.mubr.f32.mxu0 %v4653_v63  ;;  %2910 = vmatprep.mubr.msk.f32.mxu1 %vm3905_vm0, %v4653_v63 }
 0x4b5   :  { %3378 = vmatpush1.bf16.msra.mxu0 %v4301_v19  ;;  %3408 = vmatpush3.bf16.msra.mxu1 %v4374_v48 }
 0x4b6   :  { %3380 = vmatprep.subr.bf16.mxu0 %v4305_v59  ;;  %3409 = vmatprep.subr.bf16.mxu1 %v3904_v23 }
 0x4b9   :  { %3382 = vmatpush1.bf16.msra.mxu0 %v4307_v42  ;;  %3411 = vmatpush3.bf16.msra.mxu1 %v4378_v54 }
 0x4ba   :  { %3384 = vmatprep.subr.bf16.mxu0 %v4311_v13  ;;  %3412 = vmatprep.subr.bf16.mxu1 %v3904_v23 }
 0x4bd   :  { %3386 = vmatpush1.bf16.msra.mxu0 %v4313_v35  ;;  %3414 = vmatpush3.bf16.msra.mxu1 %v4382_v5 }
 0x4be   :  { %3388 = vmatprep.subr.bf16.mxu0 %v4317_v52  ;;  %3415 = vmatprep.subr.bf16.mxu1 %v3904_v23 }
 0x4c1   :  { %3390 = vmatpush1.bf16.msra.mxu0 %v4319_v6  ;;  %3417 = vmatpush3.bf16.msra.mxu1 %v4386_v26 }
 0x4c2   :  { %3392 = vmatprep.subr.bf16.mxu0 %v4323_v34  ;;  %3418 = vmatprep.subr.bf16.mxu1 %v3904_v23 }
 0x4c5   :  { %3394 = vmatpush1.bf16.msra.mxu0 %v4325_v8  ;;  %3420 = vmatpush3.bf16.msra.mxu1 %v4390_v57 }
 0x4c6   :  { %3396 = vmatprep.subr.bf16.mxu0 %v4327_v12  ;;  %3421 = vmatprep.subr.bf16.mxu1 %v3904_v23 }
 0x4c9   :  { %3398 = vmatpush1.bf16.msra.mxu0 %v4331_v33  ;;  %3423 = vmatpush3.bf16.msra.mxu1 %v4393_v20 }
 0x4ca   :  { %3400 = vmatprep.subr.bf16.mxu0 %v4334_v38  ;;  %3424 = vmatprep.subr.bf16.mxu1 %v3904_v23 }
 0x4cd   :  { %3402 = vmatpush1.bf16.msra.mxu0 %v4337_v14  ;;  %3426 = vmatpush3.bf16.msra.mxu1 %v4397_v41 }
 0x4ce   :  { %3428 = vmatprep.subr.bf16.mxu0 %v4293_v31  ;;  %3459 = vmatprep.subr.bf16.mxu1 %v3904_v23 }
 0x583   :  { %v1423_v17 = vpop.f32.mrb[8].mxu0  ;;  %v1494_v47 = vpop.f32.mrb[32].mxu1 }
 0x584   :  { %v1498_v10 = vadd.f32 %v1423_v17, %v4189_v32  ;;  %v1425_v25 = vpop.f32.mrb[9].mxu0  ;;  %v2877_v62 = vpop.f32.mrb[33].mxu1  ;;  %v1512_v31 = vadd.f32 %v4222_v58, %v1494_v47 }
 0x585   :  { %v1505_v27 = vadd.f32 %v1425_v25, %v4191_v36  ;;  %v1975_v62 = vld [vmem:[#allocation11 + $0x48] sm:$0xff] }
 0x586   :  { %v2466_v43 = vmul.f32 -1.442695, %v1498_v10  ;;  %v1976_v10 = vld [vmem:[#allocation11 + $0x50] sm:$0xff] }
 0x587   :  { %v2467_v51 = vmul.f32 -1.442695, %v1505_v27 }
 0x588   :  { %3657 = vpow2.f32 %v2466_v43 }
 0x589   :  { %3659 = vpow2.f32 %v2467_v51  ;;  %v1981_v51 = vld [vmem:[#allocation11 + $0x78] sm:$0xff] }
 0x592   :  { %v3658_v7 = vpop.eup %3657 }
 0x593   :  { %v1502_v56 = vadd.f32 1.0, %v3658_v7  ;;  %v3660_v37 = vpop.eup %3659 }
 0x594   :  { %v1509_v50 = vadd.f32 1.0, %v3660_v37  ;;  %v1988_v37 = vld [vmem:[#allocation11 + $0xb0] sm:$0xff] }
 0x595   :  { %3661 = vrcp.f32 %v1502_v56  ;;  %v1985_v56 = vld [vmem:[#allocation11 + $0x98] sm:$0xff] }
 0x596   :  { %3663 = vrcp.f32 %v1509_v50  ;;  %v3495_v50 = vpack.c.bf16 %v1988_v37, %v1985_v56  ;;  %v2196_v56 = vld [vmem:[#allocation13 + $0x18] sm:$0xff] }
 0x59f   :  { %v3662_v22 = vpop.eup %3661 }
 0x5a0   :  { %v1513_v39 = vmul.f32 %v3662_v22, %v1512_v31  ;;  %v3664_v44 = vpop.eup %3663  ;;  %v1984_v31 = vld [vmem:[#allocation11 + $0x90] sm:$0xff]  ;;  %v1987_v22 = vld [vmem:[#allocation11 + $0xa8] sm:$0xff] }
 0x5a1   :  { %v1516_v24 = vsub.f32 1.0, %v3664_v44  ;;  %v1518_v15 = vmul.f32 %v3664_v44, %v4407_v18  ;;  %v1994_v44 = vld [vmem:[#allocation11 + $0xe0] sm:$0xff] }
 0x5a2   :  { %v1514_v32 = vadd.f32 %v1513_v39, %v4213_v9  ;;  %v3497_v39 = vpack.c.bf16 %v1987_v22, %v1984_v31 }
 0x5a4   :  { %3665 = vtanh.f32 %v1514_v32  ;;  %v1991_v32 = vld [vmem:[#allocation11 + $0xc8] sm:$0xff] }
 0x5ae   :  { %v3666_v36 = vpop.eup %3665 }
 0x5af   :  { %v1517_v1 = vmul.f32 %v3666_v36, %v1516_v24  ;;  %v3499_v24 = vpack.c.bf16 %v1994_v44, %v1991_v32  ;;  %v1990_v36 = vld [vmem:[#allocation11 + $0xc0] sm:$0xff]  ;;  %v2198_v32 = vld [vmem:[#allocation13 + $0x28] sm:$0xff]  ;;  %v2200_v44 = vld [vmem:[#allocation13 + $0x38] sm:$0xff] }
 0x5b1   :  { %v4451_v28 = vadd.f32 %v1518_v15, %v1517_v1  ;;  %v1993_v1 = vld [vmem:[#allocation11 + $0xd8] sm:$0xff] }
 0x5b2   :  { %v3501_v15 = vpack.c.bf16 %v1993_v1, %v1990_v36  ;;  %v2201_v36 = vld [vmem:[#allocation13 + $0x40] sm:$0xff]  ;;  %v2202_v1 = vld [vmem:[#allocation13 + $0x48] sm:$0xff] }
 0x5b3   :  { %1641 = vmatmul.mubr.f32.vlgmr.msra.gmra.mrb[10].mxu0 %v4451_v28  ;;  %2911 = vmatmul.mubr.f32.vlgmr.msra.gmra.mrb[34].mxu1 %v4451_v28 }
 0x5b4   :  { %3430 = vmatpush1.bf16.msra.mxu0 %v4295_v4  ;;  %3461 = vmatpush3.bf16.msra.mxu1 %v4370_v21 }
 0x5b5   :  { %3432 = vmatprep.subr.bf16.mxu0 %v4299_v11  ;;  %3462 = vmatprep.subr.bf16.mxu1 %v3904_v23 }
 0x5b6   :  { %1859 = vmatprep.mubr.f32.mxu0 %v4653_v63  ;;  %2945 = vmatprep.mubr.msk.f32.mxu1 %vm3905_vm0, %v4653_v63 }
 0x5b8   :  { %3434 = vmatpush1.bf16.msra.mxu0 %v4301_v19  ;;  %3464 = vmatpush3.bf16.msra.mxu1 %v4374_v48 }
 0x5b9   :  { %3436 = vmatprep.subr.bf16.mxu0 %v4305_v59  ;;  %3465 = vmatprep.subr.bf16.mxu1 %v3904_v23 }
 0x5bc   :  { %3438 = vmatpush1.bf16.msra.mxu0 %v4307_v42  ;;  %3467 = vmatpush3.bf16.msra.mxu1 %v4378_v54 }
 0x5bd   :  { %3440 = vmatprep.subr.bf16.mxu0 %v4311_v13  ;;  %3468 = vmatprep.subr.bf16.mxu1 %v3904_v23 }
 0x5c0   :  { %3442 = vmatpush1.bf16.msra.mxu0 %v4313_v35  ;;  %3470 = vmatpush3.bf16.msra.mxu1 %v4382_v5 }
 0x5c1   :  { %3444 = vmatprep.subr.bf16.mxu0 %v4317_v52  ;;  %3471 = vmatprep.subr.bf16.mxu1 %v3904_v23 }
 0x5c4   :  { %3446 = vmatpush1.bf16.msra.mxu0 %v4319_v6  ;;  %3473 = vmatpush3.bf16.msra.mxu1 %v4386_v26 }
 0x5c5   :  { %3448 = vmatprep.subr.bf16.mxu0 %v4323_v34  ;;  %3474 = vmatprep.subr.bf16.mxu1 %v3904_v23 }
 0x5c8   :  { %3450 = vmatpush1.bf16.msra.mxu0 %v4325_v8  ;;  %3476 = vmatpush3.bf16.msra.mxu1 %v4390_v57 }
 0x5c9   :  { %3452 = vmatprep.subr.bf16.mxu0 %v4327_v12  ;;  %3477 = vmatprep.subr.bf16.mxu1 %v3904_v23 }
 0x5cc   :  { %3454 = vmatpush1.bf16.msra.mxu0 %v4331_v33  ;;  %3479 = vmatpush3.bf16.msra.mxu1 %v4393_v20 }
 0x5cd   :  { %3456 = vmatprep.subr.bf16.mxu0 %v4334_v38  ;;  %3480 = vmatprep.subr.bf16.mxu1 %v3904_v23 }
 0x5d0   :  { %3458 = vmatpush1.bf16.msra.mxu0 %v4337_v14  ;;  %3482 = vmatpush3.bf16.msra.mxu1 %v4397_v41 }
 0x5d1   :  { %3515 = vmatprep.subr.bf16.mxu1 %v3904_v23 }
 0x686   :  { %v1642_v9 = vpop.f32.mrb[10].mxu0  ;;  %v1713_v4 = vpop.f32.mrb[34].mxu1 }
 0x687   :  { %v1717_v11 = vadd.f32 %v1642_v9, %v4193_v40  ;;  %v1644_v19 = vpop.f32.mrb[11].mxu0  ;;  %v2912_v59 = vpop.f32.mrb[35].mxu1  ;;  %v1731_v12 = vadd.f32 %v4222_v58, %v1713_v4  ;;  %v1997_v9 = vld [vmem:[#allocation11 + $0xf8] sm:$0xff]  ;;  %v2000_v4 = vld [vmem:[#allocation11 + $0x110] sm:$0xff] }
 0x688   :  { %v1724_v42 = vadd.f32 %v1644_v19, %v4195_v45  ;;  %v1996_v19 = vld [vmem:[#allocation11 + $0xf0] sm:$0xff]  ;;  %v1999_v59 = vld [vmem:[#allocation11 + $0x108] sm:$0xff] }
 0x689   :  { %v2468_v13 = vmul.f32 -1.442695, %v1717_v11  ;;  %v3503_v11 = vpack.c.bf16 %v2000_v4, %v1997_v9  ;;  %v2203_v9 = vld [vmem:[#allocation13 + $0x50] sm:$0xff]  ;;  %v2204_v4 = vld [vmem:[#allocation13 + $0x58] sm:$0xff] }
 0x68a   :  { %v2469_v35 = vmul.f32 -1.442695, %v1724_v42  ;;  %v2003_v42 = vld [vmem:[#allocation11 + $0x128] sm:$0xff] }
 0x68b   :  { %3667 = vpow2.f32 %v2468_v13  ;;  %v3505_v13 = vpack.c.bf16 %v1999_v59, %v1996_v19  ;;  %v2205_v19 = vld [vmem:[#allocation13 + $0x60] sm:$0xff]  ;;  %v2206_v59 = vld [vmem:[#allocation13 + $0x68] sm:$0xff] }
 0x68c   :  { %3669 = vpow2.f32 %v2469_v35  ;;  %v2006_v35 = vld [vmem:[#allocation11 + $0x140] sm:$0xff] }
 0x695   :  { %v3668_v52 = vpop.eup %3667 }
 0x696   :  { %v1721_v6 = vadd.f32 1.0, %v3668_v52  ;;  %v3670_v34 = vpop.eup %3669  ;;  %v2002_v52 = vld [vmem:[#allocation11 + $0x120] sm:$0xff] }
 0x697   :  { %v1728_v8 = vadd.f32 1.0, %v3670_v34  ;;  %v3507_v34 = vpack.c.bf16 %v2006_v35, %v2003_v42  ;;  %v2207_v42 = vld [vmem:[#allocation13 + $0x70] sm:$0xff] }
 0x698   :  { %3671 = vrcp.f32 %v1721_v6  ;;  %v2005_v6 = vld [vmem:[#allocation11 + $0x138] sm:$0xff] }
 0x699   :  { %3673 = vrcp.f32 %v1728_v8  ;;  %v2009_v8 = vld [vmem:[#allocation11 + $0x158] sm:$0xff] }
 0x6a2   :  { %v3672_v33 = vpop.eup %3671 }
 0x6a3   :  { %v1732_v38 = vmul.f32 %v3672_v33, %v1731_v12  ;;  %v3674_v14 = vpop.eup %3673  ;;  %v2012_v12 = vld [vmem:[#allocation11 + $0x170] sm:$0xff]  ;;  %v3509_v33 = vpack.c.bf16 %v2005_v6, %v2002_v52 }
 0x6a4   :  { %v1735_v16 = vsub.f32 1.0, %v3674_v14  ;;  %v1737_v17 = vmul.f32 %v3674_v14, %v4451_v28  ;;  %v2011_v14 = vld [vmem:[#allocation11 + $0x168] sm:$0xff] }
 0x6a5   :  { %v1733_v40 = vadd.f32 %v1732_v38, %v4211_v30  ;;  %v1967_v30 = vld [vmem:[#allocation11 + $0x8] sm:$0xff]  ;;  %v3511_v38 = vpack.c.bf16 %v2012_v12, %v2009_v8 }
 0x6a7   :  { %3675 = vtanh.f32 %v1733_v40  ;;  %v2008_v40 = vld [vmem:[#allocation11 + $0x150] sm:$0xff] }
 0x6b1   :  { %v3676_v45 = vpop.eup %3675 }
 0x6b2   :  { %v1736_v29 = vmul.f32 %v3676_v45, %v1735_v16  ;;  %v2193_v16 = vld [vmem:[#allocation13] sm:$0xff]  ;;  %v2194_v45 = vld [vmem:[#allocation13 + $0x8] sm:$0xff] }
 0x6b4   :  { %v4494_v47 = vadd.f32 %v1737_v17, %v1736_v29  ;;  %v3513_v29 = vpack.c.bf16 %v2011_v14, %v2008_v40  ;;  %v3539_v17 = vpack.c.bf16 %v2194_v45, %v2193_v16 }
 0x6b6   :  { %1860 = vmatmul.mubr.f32.vlgmr.msra.gmra.mrb[12].mxu0 %v4494_v47  ;;  %2946 = vmatmul.mubr.f32.vlgmr.msra.gmra.mrb[36].mxu1 %v4494_v47 }
 0x6b7   :  { %3517 = vmatpush3.bf16.msra.mxu1 %v4370_v21  ;;  %2078 = vmatprep.mubr.f32.mxu0 %v4653_v63 }
 0x6b8   :  { %3518 = vmatprep.subr.bf16.mxu1 %v3904_v23  ;;  %2980 = vmatprep.mubr.msk.f32.mxu1 %vm3905_vm0, %v4653_v63  ;;  %v1970_v63 = vld [vmem:[#allocation11 + $0x20] sm:$0xff] }
 0x6b9   :  { %v3483_v21 = vpack.c.bf16 %v1970_v63, %v1967_v30 }
 0x6bb   :  { %3520 = vmatpush3.bf16.msra.mxu1 %v4374_v48  ;;  %v1966_v48 = vld [vmem:[#allocation11] sm:$0xff]  ;;  %3484 = vmatprep.subr.bf16.mxu0 %v3483_v21 }
 0x6bc   :  { %3521 = vmatprep.subr.bf16.mxu1 %v3904_v23 }
 0x6bf   :  { %3523 = vmatpush3.bf16.msra.mxu1 %v4378_v54  ;;  %v1969_v54 = vld [vmem:[#allocation11 + $0x18] sm:$0xff] }
 0x6c0   :  { %3524 = vmatprep.subr.bf16.mxu1 %v3904_v23 }
 0x6c3   :  { %3526 = vmatpush3.bf16.msra.mxu1 %v4382_v5  ;;  %v3485_v5 = vpack.c.bf16 %v1969_v54, %v1966_v48 }
 0x6c4   :  { %3527 = vmatprep.subr.bf16.mxu1 %v3904_v23 }
 0x6c5   :  { %3486 = vmatpush1.bf16.msra.mxu0 %v3485_v5 }
 0x6c7   :  { %3529 = vmatpush3.bf16.msra.mxu1 %v4386_v26  ;;  %v1973_v26 = vld [vmem:[#allocation11 + $0x38] sm:$0xff] }
 0x6c8   :  { %3530 = vmatprep.subr.bf16.mxu1 %v3904_v23  ;;  %v3487_v25 = vpack.c.bf16 %v1976_v10, %v1973_v26 }
 0x6ca   :  { %3488 = vmatprep.subr.bf16.mxu0 %v3487_v25 }
 0x6cb   :  { %3532 = vmatpush3.bf16.msra.mxu1 %v4390_v57  ;;  %v1972_v57 = vld [vmem:[#allocation11 + $0x30] sm:$0xff] }
 0x6cc   :  { %3533 = vmatprep.subr.bf16.mxu1 %v3904_v23  ;;  %v3489_v27 = vpack.c.bf16 %v1975_v62, %v1972_v57 }
 0x6ce   :  { %3490 = vmatpush1.bf16.msra.mxu0 %v3489_v27 }
 0x6cf   :  { %3535 = vmatpush3.bf16.msra.mxu1 %v4393_v20  ;;  %v1979_v20 = vld [vmem:[#allocation11 + $0x68] sm:$0xff] }
 0x6d0   :  { %3536 = vmatprep.subr.bf16.mxu1 %v3904_v23  ;;  %v1982_v23 = vld [vmem:[#allocation11 + $0x80] sm:$0xff] }
 0x6d1   :  { %v3491_v43 = vpack.c.bf16 %v1982_v23, %v1979_v20 }
 0x6d3   :  { %3538 = vmatpush3.bf16.msra.mxu1 %v4397_v41  ;;  %v1978_v41 = vld [vmem:[#allocation11 + $0x60] sm:$0xff]  ;;  %3492 = vmatprep.subr.bf16.mxu0 %v3491_v43 }
 0x6d4   :  { %v3493_v7 = vpack.c.bf16 %v1981_v51, %v1978_v41 }
 0x6d6   :  { %3494 = vmatpush1.bf16.msra.mxu0 %v3493_v7  ;;  %v2195_v7 = vld [vmem:[#allocation13 + $0x10] sm:$0xff] }
 0x6d7   :  { %3496 = vmatprep.subr.bf16.mxu0 %v3495_v50  ;;  %v3543_v22 = vpack.c.bf16 %v2196_v56, %v2195_v7 }
 0x6da   :  { %3498 = vmatpush1.bf16.msra.mxu0 %v3497_v39  ;;  %v2197_v39 = vld [vmem:[#allocation13 + $0x20] sm:$0xff] }
 0x6db   :  { %3500 = vmatprep.subr.bf16.mxu0 %v3499_v24 }
 0x6de   :  { %3502 = vmatpush1.bf16.msra.mxu0 %v3501_v15  ;;  %v3555_v15 = vpack.c.bf16 %v2202_v1, %v2201_v36 }
 0x6df   :  { %3504 = vmatprep.subr.bf16.mxu0 %v3503_v11  ;;  %v3559_v11 = vpack.c.bf16 %v2204_v4, %v2203_v9 }
 0x6e2   :  { %3506 = vmatpush1.bf16.msra.mxu0 %v3505_v13  ;;  %v2208_v13 = vld [vmem:[#allocation13 + $0x78] sm:$0xff] }
 0x6e3   :  { %3508 = vmatprep.subr.bf16.mxu0 %v3507_v34  ;;  %v3567_v35 = vpack.c.bf16 %v2208_v13, %v2207_v42 }
 0x6e6   :  { %3510 = vmatpush1.bf16.msra.mxu0 %v3509_v33 }
 0x6e7   :  { %3512 = vmatprep.subr.bf16.mxu0 %v3511_v38 }
 0x6ea   :  { %3514 = vmatpush1.bf16.msra.mxu0 %v3513_v29 }
 0x6eb   :  { %3540 = vmatprep.subr.bf16.mxu0 %v3539_v17 }
 0x789   :  { %v1861_v30 = vpop.f32.mrb[12].mxu0  ;;  %v1932_v63 = vpop.f32.mrb[36].mxu1 }
 0x78a   :  { %v1936_v21 = vadd.f32 %v1861_v30, %v4197_v49  ;;  %v1863_v48 = vpop.f32.mrb[13].mxu0  ;;  %v2947_v54 = vpop.f32.mrb[37].mxu1  ;;  %v1950_v20 = vadd.f32 %v4222_v58, %v1932_v63  ;;  %v2199_v58 = vld [vmem:[#allocation13 + $0x30] sm:$0xff] }
 0x78b   :  { %v1943_v5 = vadd.f32 %v1863_v48, %v4199_v55  ;;  %v3551_v24 = vpack.c.bf16 %v2200_v44, %v2199_v58 }
 0x78c   :  { %v2470_v26 = vmul.f32 -1.442695, %v1936_v21 }
 0x78d   :  { %v2471_v10 = vmul.f32 -1.442695, %v1943_v5 }
 0x78e   :  { %3677 = vpow2.f32 %v2470_v26 }
 0x78f   :  { %3679 = vpow2.f32 %v2471_v10 }
 0x798   :  { %v3678_v25 = vpop.eup %3677 }
 0x799   :  { %v1940_v57 = vadd.f32 1.0, %v3678_v25  ;;  %v3680_v62 = vpop.eup %3679 }
 0x79a   :  { %v1947_v27 = vadd.f32 1.0, %v3680_v62 }
 0x79b   :  { %3681 = vrcp.f32 %v1940_v57 }
 0x79c   :  { %3683 = vrcp.f32 %v1947_v27 }
 0x7a5   :  { %v3682_v23 = vpop.eup %3681 }
 0x7a6   :  { %v1951_v43 = vmul.f32 %v3682_v23, %v1950_v20  ;;  %v3684_v41 = vpop.eup %3683 }
 0x7a7   :  { %v1954_v51 = vsub.f32 1.0, %v3684_v41  ;;  %v1956_v50 = vmul.f32 %v3684_v41, %v4494_v47 }
 0x7a8   :  { %v1952_v49 = vadd.f32 %v1951_v43, %v4217_v46  ;;  %v3547_v46 = vpack.c.bf16 %v2198_v32, %v2197_v39 }
 0x7aa   :  { %3685 = vtanh.f32 %v1952_v49 }
 0x7b4   :  { %v3686_v55 = vpop.eup %3685 }
 0x7b5   :  { %v1955_v37 = vmul.f32 %v3686_v55, %v1954_v51 }
 0x7b7   :  { %v4521_v31 = vadd.f32 %v1956_v50, %v1955_v37 }
 0x7b9   :  { %2079 = vmatmul.mubr.f32.vlgmr.msra.gmra.mrb[14].mxu0 %v4521_v31  ;;  %2981 = vmatmul.mubr.f32.vlgmr.msra.gmra.mrb[38].mxu1 %v4521_v31 }
 0x7ba   :  { %3542 = vmatpush3.bf16.msra.mxu0 %v3539_v17  ;;  %3015 = vmatprep.mubr.f32.mxu0 %v4226_v0  ;;  %v3563_v0 = vpack.c.bf16 %v2206_v59, %v2205_v19 }
 0x7bb   :  { %3544 = vmatprep.subr.bf16.mxu0 %v3543_v22 }
 0x7be   :  { %3546 = vmatpush3.bf16.msra.mxu0 %v3543_v22 }
 0x7bf   :  { %3548 = vmatprep.subr.bf16.mxu0 %v3547_v46 }
 0x7c2   :  { %3550 = vmatpush3.bf16.msra.mxu0 %v3547_v46 }
 0x7c3   :  { %3552 = vmatprep.subr.bf16.mxu0 %v3551_v24 }
 0x7c6   :  { %3554 = vmatpush3.bf16.msra.mxu0 %v3551_v24 }
 0x7c7   :  { %3556 = vmatprep.subr.bf16.mxu0 %v3555_v15 }
 0x7ca   :  { %3558 = vmatpush3.bf16.msra.mxu0 %v3555_v15 }
 0x7cb   :  { %3560 = vmatprep.subr.bf16.mxu0 %v3559_v11 }
 0x7ce   :  { %3562 = vmatpush3.bf16.msra.mxu0 %v3559_v11 }
 0x7cf   :  { %3564 = vmatprep.subr.bf16.mxu0 %v3563_v0 }
 0x7d2   :  { %3566 = vmatpush3.bf16.msra.mxu0 %v3563_v0 }
 0x7d3   :  { %3568 = vmatprep.subr.bf16.mxu0 %v3567_v35 }
 0x7d6   :  { %3570 = vmatpush3.bf16.msra.mxu0 %v3567_v35 }
 0x7d9   :  { %3016 = vmatmul.mubr.f32.vlgmr.msra.gmra.mrb[16].mxu0 %v4270_v3 }
 0x7da   :  { %3018 = vmatprep.mubr.f32.mxu0 %v4347_v53 }
 0x7dd   :  { %3019 = vmatmul.mubr.f32.gmra.mrb[18].mxu0 %v4407_v18 }
 0x7de   :  { %3021 = vmatprep.mubr.f32.mxu0 %v4451_v28 }
 0x7e1   :  { %3022 = vmatmul.mubr.f32.gmra.mrb[20].mxu0 %v4494_v47  ;;  %v3729_v47 = vld [vmem:[%s4646_s5] ss:$0 sm:$0xff]  ;;  %s3906_s5 = smov [#allocation15]  }
 0x7e2   :  { %3024 = vmatprep.mubr.f32.mxu0 %v4521_v31 }
 0x88c   :  { %v2080_v52 = vpop.f32.mrb[14].mxu0  ;;  %v2151_v6 = vpop.f32.mrb[38].mxu1 }
 0x88d   :  { %v2155_v34 = vadd.f32 %v2080_v52, %v4201_v61  ;;  %v2082_v8 = vpop.f32.mrb[15].mxu0  ;;  %v2982_v12 = vpop.f32.mrb[39].mxu1  ;;  %v2169_v14 = vadd.f32 %v3729_v47, %v2151_v6 }
 0x88e   :  { %v2162_v33 = vadd.f32 %v2082_v8, %v4203_v2  ;;  %v2474_v2 = vld [vmem:[%s4648_s7] ss:$0 sm:$0xff]  ;;  %s2435_s7 = sshll.u32 %s3906_s5, 4  ;;  %s2436_s7 = int_to_ptr.vmem [resolvable:$true] %s2435_s7 }
 0x88f   :  { %v2472_v38 = vmul.f32 -1.442695, %v2155_v34  ;;  %s3840_s14 = scalar_lea.vmem %s2436_s7, 128  ;;  %p3845_p13 = scmp.lt.s32.totalorder %s2436_s7, %s2436_s7 }
 0x890   :  { %v2473_v3 = vmul.f32 -1.442695, %v2162_v33  ;;  %p3841_p12 = scmp.ne.s32.totalorder %s2436_s7, %s3840_s14  ;;  %p3846_p0 = scmp.lt.s32.totalorder %s3840_s14, %s3840_s14 }
 0x891   :  { %3687 = vpow2.f32 %v2472_v38 }
 0x892   :  { %3689 = vpow2.f32 %v2473_v3  ;;  %p3847_p1 = por %p3846_p0, %p3845_p13 }
 0x894   :  { %p3848_p2 = pnand %p3847_p1, %p3841_p12 }
 0x89b   :  { %v3688_v53 = vpop.eup %3687 }
 0x89c   :  { %v2159_v18 = vadd.f32 1.0, %v3688_v53  ;;  %v3690_v28 = vpop.eup %3689 }
 0x89d   :  { %v2166_v40 = vadd.f32 1.0, %v3690_v28 }
 0x89e   :  { %3691 = vrcp.f32 %v2159_v18 }
 0x89f   :  { %3693 = vrcp.f32 %v2166_v40 }
 0x8a8   :  { %v3692_v16 = vpop.eup %3691 }
 0x8a9   :  { %v2170_v61 = vmul.f32 %v3692_v16, %v2169_v14  ;;  %v3694_v5 = vpop.eup %3693 }
 0x8aa   :  { %v2173_v57 = vsub.f32 1.0, %v3694_v5  ;;  %v2175_v20 = vmul.f32 %v3694_v5, %v4521_v31 }
 0x8ab   :  { %v2171_v45 = vadd.f32 %v2170_v61, %v4215_v60 }
 0x8ac   :  { %v3017_v29 = vpop.f32.mrb[16].mxu0 }
 0x8ad   :  { %3695 = vtanh.f32 %v2171_v45  ;;  %v4541_v17 = vadd.f32 %v3017_v29, %v2474_v2  ;;  %v2282_v30 = vpop.f32.mrb[17].mxu0 }
 0x8ae   :  { %v4544_v21 = vadd.f32 %v2474_v2, %v2282_v30 }
 0x8af   :  { %2323 = vmax.xlane.f32.xlu0 %v4541_v17 }
 0x8b0   :  { %v3020_v63 = vpop.f32.mrb[18].mxu0 }
 0x8b1   :  { %v4546_v48 = vadd.f32 %v3020_v63, %v2474_v2  ;;  %v2292_v54 = vpop.f32.mrb[19].mxu0 }
 0x8b2   :  { %v4550_v60 = vadd.f32 %v2474_v2, %v2292_v54 }
 0x8b3   :  { %2327 = vmax.xlane.f32.xlu1 %v4546_v48  ;;  %2321 = vmax.xlane.f32.xlu0 %v4544_v21 }
 0x8b4   :  { %v3023_v26 = vpop.f32.mrb[20].mxu0 }
 0x8b5   :  { %v2302_v10 = vpop.f32.mrb[21].mxu0  ;;  %v4557_v23 = vadd.f32 %v3023_v26, %v2474_v2 }
 0x8b6   :  { %v4552_v25 = vadd.f32 %v2474_v2, %v2302_v10 }
 0x8b7   :  { %v3696_v62 = vpop.eup %3695  ;;  %2325 = vmax.xlane.f32.xlu1 %v4550_v60 }
 0x8b8   :  { %2329 = vmax.xlane.f32.xlu0 %v4552_v25  ;;  %v2174_v27 = vmul.f32 %v3696_v62, %v2173_v57 }
 0x8ba   :  { %v2176_v43 = vadd.f32 %v2175_v20, %v2174_v27 }
 0x8bb   :  { %2331 = vmax.xlane.f32.xlu1 %v4557_v23 }
 0x8bc   :  { %3025 = vmatmul.mubr.f32.gmra.mrb[22].mxu0 %v2176_v43 }
 0x93c   :  { %v4560_v49 = vpop.xlane.xlu0 %2323 }
 0x93d   :  { %v2338_v7 = vsub.f32 %v4541_v17, %v4560_v49 }
 0x93f   :  { %v2347_v37 = vmul.f32 1.442695, %v2338_v7 }
 0x940   :  { %v4562_v41 = vpop.xlane.xlu1 %2327  ;;  %v4564_v51 = vpop.xlane.xlu0 %2321 }
 0x941   :  { %v2337_v56 = vsub.f32 %v4544_v21, %v4564_v51  ;;  %v2340_v50 = vsub.f32 %v4546_v48, %v4562_v41  ;;  %3697 = vpow2.f32 %v2347_v37 }
 0x943   :  { %v2345_v31 = vmul.f32 1.442695, %v2337_v56  ;;  %v2351_v46 = vmul.f32 1.442695, %v2340_v50 }
 0x944   :  { %v4566_v55 = vpop.xlane.xlu1 %2325 }
 0x945   :  { %v2339_v22 = vsub.f32 %v4550_v60, %v4566_v55  ;;  %v4578_v32 = vpop.xlane.xlu0 %2329  ;;  %3699 = vpow2.f32 %v2345_v31 }
 0x946   :  { %v2341_v24 = vsub.f32 %v4552_v25, %v4578_v32  ;;  %3701 = vpow2.f32 %v2351_v46 }
 0x947   :  { %v2349_v44 = vmul.f32 1.442695, %v2339_v22 }
 0x948   :  { %v4576_v39 = vpop.xlane.xlu1 %2331  ;;  %v2353_v15 = vmul.f32 1.442695, %v2341_v24 }
 0x949   :  { %v2342_v58 = vsub.f32 %v4557_v23, %v4576_v39  ;;  %3703 = vpow2.f32 %v2349_v44 }
 0x94b   :  { %v2355_v36 = vmul.f32 1.442695, %v2342_v58  ;;  %v3698_v19 = vpop.eup %3697 }
 0x94d   :  { %3705 = vpow2.f32 %v2355_v36 }
 0x94e   :  { %3707 = vpow2.f32 %v2353_v15 }
 0x94f   :  { %v3700_v59 = vpop.eup %3699 }
 0x950   :  { %v3702_v0 = vpop.eup %3701 }
 0x953   :  { %v3704_v42 = vpop.eup %3703 }
 0x957   :  { %v3706_v13 = vpop.eup %3705 }
 0x958   :  { %v3708_v35 = vpop.eup %3707 }
 0x98f   :  { %v3026_v1 = vpop.f32.mrb[22].mxu0 }
 0x990   :  { %v4584_v9 = vadd.f32 %v3026_v1, %v2474_v2  ;;  %v2312_v4 = vpop.f32.mrb[23].mxu0 }
 0x991   :  { %v4586_v11 = vadd.f32 %v2474_v2, %v2312_v4 }
 0x992   :  { %2335 = vmax.xlane.f32.xlu1 %v4584_v9 }
 0x993   :  { %2333 = vmax.xlane.f32.xlu0 %v4586_v11 }
 0x996   :  { %2363 = vadd.xlane.f32.xlu1 %v3698_v19 }
 0x997   :  { %2361 = vadd.xlane.f32.xlu0 %v3700_v59 }
 0x99a   :  { %2367 = vadd.xlane.f32.xlu1 %v3702_v0 }
 0x99b   :  { %2365 = vadd.xlane.f32.xlu0 %v3704_v42 }
 0x99e   :  { %2371 = vadd.xlane.f32.xlu1 %v3706_v13 }
 0x99f   :  { %2369 = vadd.xlane.f32.xlu0 %v3708_v35 }
 0xa1f   :  { %v4590_v52 = vpop.xlane.xlu1 %2335 }
 0xa20   :  { %v2344_v6 = vsub.f32 %v4584_v9, %v4590_v52  ;;  %v4594_v34 = vpop.xlane.xlu0 %2333 }
 0xa21   :  { %v2343_v8 = vsub.f32 %v4586_v11, %v4594_v34 }
 0xa22   :  { %v2359_v12 = vmul.f32 1.442695, %v2344_v6 }
 0xa23   :  { %v2357_v33 = vmul.f32 1.442695, %v2343_v8  ;;  %v2364_v38 = vpop.xlane.xlu1 %2363 }
 0xa24   :  { %3709 = vpow2.f32 %v2359_v12  ;;  %v2362_v3 = vpop.xlane.xlu0 %2361 }
 0xa25   :  { %3711 = vpow2.f32 %v2357_v33 }
 0xa26   :  { %3713 = vlog2.f32 %v2364_v38 }
 0xa27   :  { %3715 = vlog2.f32 %v2362_v3  ;;  %v2368_v53 = vpop.xlane.xlu1 %2367 }
 0xa28   :  { %3717 = vlog2.f32 %v2368_v53  ;;  %v2366_v18 = vpop.xlane.xlu0 %2365 }
 0xa29   :  { %3719 = vlog2.f32 %v2366_v18 }
 0xa2b   :  { %v2372_v28 = vpop.xlane.xlu1 %2371 }
 0xa2c   :  { %3721 = vlog2.f32 %v2372_v28  ;;  %v2370_v40 = vpop.xlane.xlu0 %2369 }
 0xa2d   :  { %3723 = vlog2.f32 %v2370_v40 }
 0xa2e   :  { %v3710_v47 = vpop.eup %3709 }
 0xa2f   :  { %v3712_v14 = vpop.eup %3711  ;;  %2375 = vadd.xlane.f32.xlu1 %v3710_v47 }
 0xa30   :  { %v3714_v16 = vpop.eup %3713  ;;  %2373 = vadd.xlane.f32.xlu0 %v3712_v14 }
 0xa31   :  { %v3716_v61 = vpop.eup %3715  ;;  %v2380_v2 = vmul.f32 0.6931472, %v3714_v16 }
 0xa32   :  { %v3718_v45 = vpop.eup %3717  ;;  %v2378_v29 = vmul.f32 0.6931472, %v3716_v61 }
 0xa33   :  { %v3720_v30 = vpop.eup %3719  ;;  %v2394_v63 = vadd.f32 %v2380_v2, %v4560_v49  ;;  %v2384_v54 = vmul.f32 0.6931472, %v3718_v45 }
 0xa34   :  { %v2393_v5 = vadd.f32 %v2378_v29, %v4564_v51  ;;  %v2382_v26 = vmul.f32 0.6931472, %v3720_v30 }
 0xa35   :  { %v2402_v10 = vsub.f32 %v4541_v17, %v2394_v63  ;;  %v2396_v57 = vadd.f32 %v2384_v54, %v4562_v41 }
 0xa36   :  { %v3722_v62 = vpop.eup %3721  ;;  %v2401_v27 = vsub.f32 %v4544_v21, %v2393_v5  ;;  %v2395_v20 = vadd.f32 %v2382_v26, %v4566_v55 }
 0xa37   :  { %v3724_v43 = vpop.eup %3723  ;;  %2410 = vst [vmem:[#allocation14 + $0x8] sm:$0xff] %v2402_v10  ;;  %v2404_v7 = vsub.f32 %v4546_v48, %v2396_v57  ;;  %v2388_v56 = vmul.f32 0.6931472, %v3722_v62 }
 0xa38   :  { %2409 = vst [vmem:[#allocation14] sm:$0xff] %v2401_v27  ;;  %v2403_v49 = vsub.f32 %v4550_v60, %v2395_v20  ;;  %v2386_v37 = vmul.f32 0.6931472, %v3724_v43 }
 0xa39   :  { %2412 = vst [vmem:[#allocation14 + $0x18] sm:$0xff] %v2404_v7  ;;  %v2398_v51 = vadd.f32 %v2388_v56, %v4576_v39 }
 0xa3a   :  { %2411 = vst [vmem:[#allocation14 + $0x10] sm:$0xff] %v2403_v49  ;;  %v2397_v17 = vadd.f32 %v2386_v37, %v4578_v32 }
 0xa3b   :  { %v2406_v41 = vsub.f32 %v4557_v23, %v2398_v51 }
 0xa3c   :  { %v2405_v21 = vsub.f32 %v4552_v25, %v2397_v17 }
 0xa3d   :  { %2414 = vst [vmem:[#allocation14 + $0x28] sm:$0xff] %v2406_v41 }
 0xa3e   :  { %2413 = vst [vmem:[#allocation14 + $0x20] sm:$0xff] %v2405_v21 }
 0xa3f   :  { %3851 = shalt.err (!%p3848_p2)
}
 0xa40   :  { %s3852_s17 = scalar_lea.hbm %s4650_s9, 128 }
 0xa41   :  { %p3853_p3 = scmp.ne.s32.totalorder %s4650_s9, %s3852_s17  ;;  %p3856_p4 = scmp.lt.u32.totalorder %s3852_s17, %s4650_s9 }
 0xa43   :  { %p3858_p5 = pnand %p3856_p4, %p3853_p3 }
 0xa45   :  { %3861 = shalt.err (!%p3858_p5)
}
 0xa46   :  { %2438 = dma.vmem_to_hbm [thread:$0]  %s2436_s7, 128, %s4650_s9, [#allocation16]  }
 0xa47   :  { %s3907_s23 = smov [#allocation14]  }
 0xa48   :  { %s2422_s25 = sshll.u32 %s3907_s23, 4  ;;  %s2423_s25 = int_to_ptr.vmem [resolvable:$true] %s2422_s25 }
 0xa49   :  { %s3862_s9 = scalar_lea.vmem %s2423_s25, 1024  ;;  %p3867_p7 = scmp.lt.s32.totalorder %s2423_s25, %s2423_s25 }
 0xa4a   :  { %p3863_p6 = scmp.ne.s32.totalorder %s2423_s25, %s3862_s9  ;;  %p3868_p8 = scmp.lt.s32.totalorder %s3862_s9, %s3862_s9 }
 0xa4c   :  { %p3869_p9 = por %p3868_p8, %p3867_p7 }
 0xa4e   :  { %p3870_p10 = pnand %p3869_p9, %p3863_p6 }
 0xabc   :  { %v2376_v48 = vpop.xlane.xlu1 %2375 }
 0xabd   :  { %3725 = vlog2.f32 %v2376_v48  ;;  %v2374_v60 = vpop.xlane.xlu0 %2373 }
 0xabe   :  { %3727 = vlog2.f32 %v2374_v60 }
 0xac7   :  { %v3726_v25 = vpop.eup %3725 }
 0xac8   :  { %v3728_v23 = vpop.eup %3727  ;;  %v2392_v55 = vmul.f32 0.6931472, %v3726_v25 }
 0xac9   :  { %v2390_v50 = vmul.f32 0.6931472, %v3728_v23 }
 0xaca   :  { %v2400_v31 = vadd.f32 %v2392_v55, %v4590_v52 }
 0xacb   :  { %v2399_v22 = vadd.f32 %v2390_v50, %v4594_v34 }
 0xacc   :  { %v2408_v39 = vsub.f32 %v4584_v9, %v2400_v31 }
 0xacd   :  { %v2407_v32 = vsub.f32 %v4586_v11, %v2399_v22 }
 0xace   :  { %2416 = vst [vmem:[#allocation14 + $0x38] sm:$0xff] %v2408_v39 }
 0xacf   :  { %2415 = vst [vmem:[#allocation14 + $0x30] sm:$0xff] %v2407_v32 }
 0xad0   :  { %3873 = shalt.err (!%p3870_p10)
}
 0xad1   :  { %s3874_s29 = scalar_lea.hbm %s4649_s8, 1024 }
 0xad2   :  { %p3875_p11 = scmp.ne.s32.totalorder %s4649_s8, %s3874_s29  ;;  %p3878_p12 = scmp.lt.u32.totalorder %s3874_s29, %s4649_s8 }
 0xad4   :  { %p3880_p13 = pnand %p3878_p12, %p3875_p11 }
 0xad6   :  { %3883 = shalt.err (!%p3880_p13)
}
 0xad7   :  { %2428 = dma.vmem_to_hbm [thread:$0]  %s2423_s25, 1024, %s4649_s8, [#allocation7], %s3899_s3, %s3899_s3, %s3900_s22  }
 0xad8   :  { %3890 = dma.done.wait [#allocation7], 1024  }
 0xad9   :  { %3891 = vsyncadd [#allocation7], 4294966272 }
 0xada   :  { %3892 = dma.done.wait [#allocation16], 128  }
 0xadb   :  { %3893 = vsyncadd [#allocation16], 4294967168 }
 0xadc   :  { %2445 = vsyncpa [#allocation6], 1 }
 0xadd   :  { %2446 = vsyncpa [#allocation9], 1 }
 0xade   :  { %2447 = vsyncpa [#allocation12], 1 }
 0xadf   :  { %2448 = vsyncpa [#allocation7], 1 }
 0xae0   :  { %2449 = vsyncpa [#allocation16], 1 }

</bundles_post_ra>
